<compile_context>
chip_gen: v7x
topology: tpu7x:2x2x1
jax: 0.10.0
libtpu: 0.0.40
codegen_flags: <defaults>
</compile_context>

<pallas_src>
import functools

import jax
import jax.numpy as jnp
from jax.experimental import pallas as pl
from jax.experimental.pallas import tpu as pltpu

EPS = 1e-5
LANES = 128


def _round_up(x, m):
    return (x + m - 1) // m * m


def _vmem_limit_bytes():
    """Generation-aware scoped-VMEM limit (v7x: 64 MiB/TC, v5e/v6e: 128 MiB)."""
    cap = 64 * 1024 * 1024
    try:
        cap = pltpu.get_tpu_info().vmem_capacity_bytes
    except Exception:
        pass
    return int(min(100 * 1024 * 1024, (cap * 3) // 4))


VMEM_LIMIT = _vmem_limit_bytes()


def _pick_tiles(n, c):
    """Channel padding + row/reduction tiles sized against the VMEM budget."""
    c_p = _round_up(max(c, LANES), LANES)
    tile_n = 256 if n >= 2048 else 128           # keeps num_i >= 2 for small graphs (v7x)
    n_p = _round_up(n, tile_n)
    budget = min(VMEM_LIMIT // 3, 24 * 1024 * 1024)
    # Collapse the reduction axis (X fully resident, one long-contraction dot per
    # row tile) when the double-buffered A row panel + X fit the budget.
    if 2 * 2 * (tile_n * n_p + n_p * c_p) <= budget:
        tile_k = n_p
    else:
        tile_k = tile_n
        for cand in (256, 512, 1024, 2048):
            if cand <= n_p and n_p % cand == 0 and \
                    2 * 2 * (tile_n * cand + cand * c_p) <= budget:
                tile_k = cand
    return n_p, c_p, tile_n, tile_k


# --------------------------------------------------------------------------- #
# Kernel 1: GCNConv row tile + fused per-graph partial moments
#   grid = (row tiles i [parallel],  A_hat column tiles k [arbitrary/reduction])
#   acc  += A[i,k] @ X[k]                         (bf16 x bf16 -> f32 MXU)
#   at k == last:  h = bf16(acc) @ W_bf16 + b ;   p12 = (S_T/|G|) @ [h, h*h]
# --------------------------------------------------------------------------- #
def conv_stats_kernel(a_ref, x_ref, w_ref, b_ref, st_ref,
                      h_ref, p12_ref, acc_ref):
    k = pl.program_id(1)

    @pl.when(k == 0)
    def _():
        acc_ref[...] = jnp.zeros_like(acc_ref)

    acc_ref[...] += jnp.dot(a_ref[...], x_ref[...],
                            preferred_element_type=jnp.float32)

    @pl.when(k == pl.num_programs(1) - 1)
    def _():
        # Weight matmul in bf16 with f32 accumulation (full MXU rate on all gens).
        h = jnp.dot(acc_ref[...].astype(jnp.bfloat16), w_ref[...],
                    preferred_element_type=jnp.float32) + b_ref[...]
        h_ref[...] = h.astype(h_ref.dtype)
        # Single MXU push for both per-graph moments: (S_T/|G|) @ [h, h*h].
        hh = jnp.concatenate([h, h * h], axis=-1)
        p12_ref[0, :, :] = jnp.dot(st_ref[...], hh,
                                   preferred_element_type=jnp.float32)


def gcn_conv_stats(a_bf16, x_bf16, w_bf16, b, st_w, *, tile_n, tile_k):
    n_p, c_p = x_bf16.shape
    g = st_w.shape[0]
    num_i, num_k = n_p // tile_n, n_p // tile_k
    flops = 2 * n_p * n_p * c_p + 2 * n_p * c_p * c_p + 2 * n_p * g * 2 * c_p
    bytes_acc = (n_p * n_p * 2 + num_i * tile_k * num_k * c_p * 2 + c_p * c_p * 2
                 + n_p * c_p * 2 + num_i * g * 2 * c_p * 4 + g * n_p * 4)
    return pl.pallas_call(
        conv_stats_kernel,
        out_shape=(jax.ShapeDtypeStruct((n_p, c_p), jnp.bfloat16),
                   jax.ShapeDtypeStruct((num_i, g, 2 * c_p), jnp.float32)),
        grid_spec=pltpu.PrefetchScalarGridSpec(
            num_scalar_prefetch=0,
            grid=(num_i, num_k),
            in_specs=[
                pl.BlockSpec((tile_n, tile_k), lambda i, k: (i, k)),   # A_hat (bf16)
                pl.BlockSpec((tile_k, c_p), lambda i, k: (k, 0)),      # X (bf16; resident if tile_k == n_p)
                pl.BlockSpec((c_p, c_p), lambda i, k: (0, 0)),         # W (bf16, resident)
                pl.BlockSpec((1, c_p), lambda i, k: (0, 0)),           # bias (f32, resident)
                pl.BlockSpec((g, tile_n), lambda i, k: (0, i)),        # S_T/|G| (f32)
            ],
            out_specs=(
                pl.BlockSpec((tile_n, c_p), lambda i, k: (i, 0)),        # h (bf16)
                pl.BlockSpec((1, g, 2 * c_p), lambda i, k: (i, 0, 0)),   # [sum h, sum h^2] partials
            ),
            scratch_shapes=[pltpu.VMEM((tile_n, c_p), jnp.float32)],
        ),
        compiler_params=pltpu.CompilerParams(
            dimension_semantics=("parallel", "arbitrary"),
            vmem_limit_bytes=VMEM_LIMIT),
        cost_estimate=pl.CostEstimate(flops=flops, transcendentals=0,
                                      bytes_accessed=bytes_acc),
    )(a_bf16, x_bf16, w_bf16, b, st_w)


# --------------------------------------------------------------------------- #
# Kernel 2: GraphNorm apply + ReLU + dropout(eval) + residual + partial mean-pool
# --------------------------------------------------------------------------- #
def norm_relu_residual_pool_kernel(h_ref, x_ref, s_ref, ms_ref, beta_ref, st_ref,
                                   o_ref, pool_ref):
    c_p = h_ref.shape[1]
    # Broadcast both per-graph stats to nodes with a single one-hot matmul.
    stats = jnp.dot(s_ref[...], ms_ref[...], preferred_element_type=jnp.float32)
    mean_n = stats[:, :c_p]           # alpha * mean, gathered per node
    scale_n = stats[:, c_p:]          # gamma * rsqrt(var + eps), gathered per node
    h = h_ref[...].astype(jnp.float32)
    normed = (h - mean_n) * scale_n + beta_ref[...]
    # TODO(synk): dropout is identity here (eval mode); training would draw a mask
    # with pltpu.prng_random_bits.
    out = jnp.maximum(normed, 0.0) + x_ref[...].astype(jnp.float32)
    o_ref[...] = out.astype(o_ref.dtype)
    # Fused partial global_mean_pool for this row tile: (S_T/|G|) @ out.
    pool_ref[0, :, :] = jnp.dot(st_ref[...], out,
                                preferred_element_type=jnp.float32)


def graph_norm_relu_residual_pool(h, x, s_onehot, ms, beta, st_w, *, tile_n):
    n_p, c_p = h.shape
    g = st_w.shape[0]
    num_i = n_p // tile_n
    return pl.pallas_call(
        norm_relu_residual_pool_kernel,
        out_shape=(jax.ShapeDtypeStruct((n_p, c_p), jnp.bfloat16),
                   jax.ShapeDtypeStruct((num_i, g, c_p), jnp.float32)),
        grid=(num_i,),
        in_specs=[
            pl.BlockSpec((tile_n, c_p), lambda i: (i, 0)),      # h (bf16)
            pl.BlockSpec((tile_n, c_p), lambda i: (i, 0)),      # residual x (bf16)
            pl.BlockSpec((tile_n, g), lambda i: (i, 0)),        # one-hot graph ids
            pl.BlockSpec((g, 2 * c_p), lambda i: (0, 0)),       # [alpha*mean, gamma*inv_std]
            pl.BlockSpec((1, c_p), lambda i: (0, 0)),           # beta (resident)
            pl.BlockSpec((g, tile_n), lambda i: (0, i)),        # S_T/|G|
        ],
        out_specs=(
            pl.BlockSpec((tile_n, c_p), lambda i: (i, 0)),      # new node features (bf16)
            pl.BlockSpec((1, g, c_p), lambda i: (i, 0, 0)),     # partial mean-pool
        ),
        compiler_params=pltpu.CompilerParams(
            dimension_semantics=("parallel",),
            vmem_limit_bytes=VMEM_LIMIT),
    )(h, x, s_onehot, ms, beta, st_w)


# ----------------------------- plain-JAX glue -------------------------------- #
def build_gcn_adjacency(edge_index, num_nodes):
    """Dense A_hat matching PyG: to_undirected(+coalesce) then gcn_norm with
    add_remaining_self_loops (existing self-loops replaced by weight-1 loops)."""
    row, col = edge_index[0], edge_index[1]
    adj = jnp.zeros((num_nodes, num_nodes), jnp.float32)
    adj = adj.at[row, col].max(jnp.ones_like(row, jnp.float32))
    adj = jnp.maximum(adj, adj.T)                         # undirected, coalesced
    eye = jnp.eye(num_nodes, dtype=jnp.float32)
    adj = adj * (1.0 - eye) + eye                         # add_remaining_self_loops
    deg = jnp.sum(adj, axis=1)
    dinv = jnp.where(deg > 0, jax.lax.rsqrt(deg), 0.0)
    return adj * dinv[:, None] * dinv[None, :]


def prepare_params(params, c, c_p):
    """Hoisted (one-time) parameter padding; W pre-cast to bf16 for the MXU."""
    padded = []
    for (w, b, alpha, gamma, beta) in params:
        w_p = jnp.zeros((c_p, c_p), jnp.float32).at[:c, :c].set(w).astype(jnp.bfloat16)
        b_p = jnp.zeros((1, c_p), jnp.float32).at[:, :c].set(b)
        al_p = jnp.zeros((1, c_p), jnp.float32).at[:, :c].set(alpha)
        ga_p = jnp.zeros((1, c_p), jnp.float32).at[:, :c].set(gamma)
        be_p = jnp.zeros((1, c_p), jnp.float32).at[:, :c].set(beta)
        padded.append((w_p, b_p, al_p, ga_p, be_p))
    return padded


@functools.partial(jax.jit, static_argnames=("num_graphs",))
def gcn_net_forward(x, edge_index, batch, padded_params, *, num_graphs):
    """Pallas forward of GCNNet. Returns (graph embeddings [G, C], node feats [N, C])."""
    n, c = x.shape
    n_p, c_p, tile_n, tile_k = _pick_tiles(n, c)
    pad_n = n_p - n
    g_real = num_graphs + (1 if pad_n else 0)             # padded nodes -> dummy graph
    g_pad = _round_up(max(g_real, 8), 8)

    # TODO(synk): edge_drop > 0 (drop_edge) is a random edge subsample; identity here
    # (GCNNet default edge_drop=0.0, and eval-mode forward).
    a_hat = build_gcn_adjacency(edge_index, n)
    a_bf16 = jnp.zeros((n_p, n_p), jnp.float32).at[:n, :n].set(a_hat).astype(jnp.bfloat16)

    if pad_n:
        batch_p = jnp.concatenate([batch, jnp.full((pad_n,), num_graphs, batch.dtype)])
    else:
        batch_p = batch
    s_onehot = (batch_p[:, None] == jnp.arange(g_pad)[None, :]).astype(jnp.float32)
    counts = jnp.maximum(jnp.sum(s_onehot, axis=0), 1.0)
    st_w = s_onehot.T / counts[:, None]                   # [G_pad, N_p], rows sum to 1

    x_p = jnp.zeros((n_p, c_p), jnp.float32).at[:n, :c].set(x).astype(jnp.bfloat16)

    # Fallback pool (only used when the net has zero blocks, i.e. num_layers == 1).
    pool = st_w @ x_p.astype(jnp.float32)

    for (w_bf16, b_p, al_p, ga_p, be_p) in padded_params:
        h, p12 = gcn_conv_stats(a_bf16, x_p, w_bf16, b_p, st_w,
                                tile_n=tile_n, tile_k=tile_k)
        moments = jnp.sum(p12, axis=0)                    # [G_pad, 2*C_p]
        mean_g = moments[:, :c_p]                         # E[h]
        ex2_g = moments[:, c_p:]                          # E[h^2]
        var_g = jnp.maximum(ex2_g - (2.0 * al_p - al_p * al_p) * mean_g * mean_g, 0.0)
        ms = jnp.concatenate([al_p * mean_g,
                              ga_p * jax.lax.rsqrt(var_g + EPS)], axis=-1)
        x_p, pool_parts = graph_norm_relu_residual_pool(
            h, x_p, s_onehot, ms, be_p, st_w, tile_n=tile_n)
        pool = jnp.sum(pool_parts, axis=0)                # only the last layer's is used

    pooled = pool[:num_graphs, :c]
    nodes = x_p.astype(jnp.float32)[:n, :c]
    return pooled, nodes


def reference_forward(x, edge_index, batch, params, num_graphs):
    """Pure f32 dense reference matching the PyTorch module semantics (eval mode)."""
    a_hat = build_gcn_adjacency(edge_index, x.shape[0])
    s = (batch[:, None] == jnp.arange(num_graphs)[None, :]).astype(jnp.float32)
    cnt = jnp.sum(s, axis=0)[:, None]
    for (w, b, alpha, gamma, beta) in params:
        h = a_hat @ (x @ w) + b
        mean = (s.T @ h) / cnt
        out = h - (s @ mean) * alpha
        var = (s.T @ (out * out)) / cnt
        std = jnp.sqrt(var + EPS)
        normed = gamma * out / (s @ std) + beta
        x = jnp.maximum(normed, 0.0) + x
    return (s.T @ x) / cnt, x


if __name__ == "__main__":
    N, C, G, NUM_LAYERS = 200, 64, 2, 3       # GCNNet(d_in=64, num_layers=3) -> 2 blocks
    E_PER_GRAPH = 256

    key = jax.random.PRNGKey(0)
    kx, ke0, ke1, kp = jax.random.split(key, 4)

    x = jax.random.normal(kx, (N, C), dtype=jnp.float32)
    half = N // G
    e0 = jax.random.randint(ke0, (2, E_PER_GRAPH), 0, half, dtype=jnp.int32)
    e1 = jax.random.randint(ke1, (2, E_PER_GRAPH), half, N, dtype=jnp.int32)
    edge_index = jnp.concatenate([e0, e1], axis=1)
    batch = jnp.concatenate([jnp.zeros((half,), jnp.int32),
                             jnp.ones((N - half,), jnp.int32)])

    params = []
    limit = (6.0 / (C + C)) ** 0.5
    for _ in range(NUM_LAYERS - 1):
        kw, kb, ka, kg, kbt, kp = jax.random.split(kp, 6)
        w = jax.random.uniform(kw, (C, C), jnp.float32, -limit, limit)    # GCNConv weight
        b = 0.1 * jax.random.normal(kb, (1, C), jnp.float32)              # GCNConv bias
        alpha = 1.0 + 0.1 * jax.random.normal(ka, (1, C), jnp.float32)    # mean_scale
        gamma = 1.0 + 0.1 * jax.random.normal(kg, (1, C), jnp.float32)    # norm weight
        beta = 0.1 * jax.random.normal(kbt, (1, C), jnp.float32)          # norm bias
        params.append((w, b, alpha, gamma, beta))

    c_pad = _round_up(max(C, LANES), LANES)
    padded_params = prepare_params(params, C, c_pad)       # hoisted out of the call path

    pooled, nodes = gcn_net_forward(x, edge_index, batch, padded_params, num_graphs=G)
    pooled = jax.block_until_ready(pooled)
    nodes = jax.block_until_ready(nodes)

    ref_pooled, ref_nodes = reference_forward(x, edge_index, batch, params, G)

    # bf16 end-to-end pipeline vs f32 reference: check normalized max error.
    def _max_rel_err(a, b):
        return float(jnp.max(jnp.abs(a - b)) / (jnp.max(jnp.abs(b)) + 1e-8))

    node_err = _max_rel_err(nodes, ref_nodes)
    pool_err = _max_rel_err(pooled, ref_pooled)
    assert node_err < 2.5e-2, f"node features mismatch (max rel err {node_err:.4f})"
    assert pool_err < 2.5e-2, f"pooled output mismatch (max rel err {pool_err:.4f})"

    print("KERNEL_OK")
</pallas_src>

<mosaic_0001>
module attributes {stable_mosaic.version = 11 : i64} {
  func.func private @main(%arg0: i32) attributes {dimension_semantics = [#tpu.dimension_semantics<core_parallel>], iteration_bounds = array<i64: 2>, tpu.core_type = #tpu.core_type<sc_scalar_subcore>, window_params = []} {
    return
  }
}

module attributes {stable_mosaic.version = 11 : i64} {
  func.func private @main(%arg0: i32) attributes {dimension_semantics = [#tpu.dimension_semantics<core_parallel>], iteration_bounds = array<i64: 2>, tpu.core_type = #tpu.core_type<sc_scalar_subcore>, window_params = []} {
    return
  }
}

module attributes {stable_mosaic.version = 11 : i64} {
  func.func @norm_relu_residual_pool_kernel(%arg0: i32, %arg1: memref<128x128xbf16, #tpu.memory_space<vmem>>, %arg2: memref<128x128xbf16, #tpu.memory_space<vmem>>, %arg3: memref<128x8xf32, #tpu.memory_space<vmem>>, %arg4: memref<8x256xf32, #tpu.memory_space<vmem>>, %arg5: memref<1x128xf32, #tpu.memory_space<vmem>>, %arg6: memref<8x128xf32, #tpu.memory_space<vmem>>, %arg7: memref<128x128xbf16, #tpu.memory_space<vmem>>, %arg8: memref<1x8x128xf32, #tpu.memory_space<vmem>>) attributes {dimension_semantics = [#tpu.dimension_semantics<parallel>], iteration_bounds = array<i64: 2>, scalar_prefetch = 0 : i64, scratch_operands = 0 : i64, tpu.core_type = #tpu.core_type<tc>, window_params = [{transform_indices = @transform_0, window_bounds = array<i64: 128, 128>}, {transform_indices = @transform_1, window_bounds = array<i64: 128, 128>}, {transform_indices = @transform_2, window_bounds = array<i64: 128, 8>}, {pipeline_mode = #tpu.pipeline_mode<synchronous>, transform_indices = @transform_3, window_bounds = array<i64: 8, 256>}, {pipeline_mode = #tpu.pipeline_mode<synchronous>, transform_indices = @transform_4, window_bounds = array<i64: 1, 128>}, {transform_indices = @transform_5, window_bounds = array<i64: 8, 128>}, {transform_indices = @transform_6, window_bounds = array<i64: 128, 128>}, {transform_indices = @transform_7, window_bounds = array<i64: 1, 8, 128>}]} {
    %c0 = arith.constant 0 : index
    %c0_0 = arith.constant 0 : index
    %0 = vector.load %arg3[%c0, %c0_0] : memref<128x8xf32, #tpu.memory_space<vmem>>, vector<128x8xf32>
    %c0_1 = arith.constant 0 : index
    %c0_2 = arith.constant 0 : index
    %1 = vector.load %arg4[%c0_1, %c0_2] : memref<8x256xf32, #tpu.memory_space<vmem>>, vector<8x256xf32>
    %cst = arith.constant dense<0.000000e+00> : vector<128x256xf32>
    %2 = tpu.matmul %0, %1, %cst {dimension_numbers = #tpu.dot_dimension_numbers<[1], [0], [0], [1], [0, 0, 1, 1], [], []>} : vector<128x8xf32>, vector<8x256xf32>, vector<128x256xf32> -> vector<128x256xf32>
    %3 = vector.extract_strided_slice %2 {offsets = [0, 0], sizes = [128, 128], strides = [1, 1]} : vector<128x256xf32> to vector<128x128xf32>
    %4 = vector.extract_strided_slice %2 {offsets = [0, 128], sizes = [128, 128], strides = [1, 1]} : vector<128x256xf32> to vector<128x128xf32>
    %c0_3 = arith.constant 0 : index
    %c0_4 = arith.constant 0 : index
    %5 = vector.load %arg1[%c0_3, %c0_4] : memref<128x128xbf16, #tpu.memory_space<vmem>>, vector<128x128xbf16>
    %6 = arith.extf %5 : vector<128x128xbf16> to vector<128x128xf32>
    %7 = arith.subf %6, %3 : vector<128x128xf32>
    %8 = arith.mulf %7, %4 : vector<128x128xf32>
    %c0_5 = arith.constant 0 : index
    %c0_6 = arith.constant 0 : index
    %9 = vector.load %arg5[%c0_5, %c0_6] : memref<1x128xf32, #tpu.memory_space<vmem>>, vector<1x128xf32>
    %10 = vector.broadcast %9 : vector<1x128xf32> to vector<128x128xf32>
    %11 = arith.addf %8, %10 : vector<128x128xf32>
    %cst_7 = arith.constant 0.000000e+00 : f32
    %12 = vector.broadcast %cst_7 : f32 to vector<128x128xf32>
    %13 = arith.maximumf %11, %12 : vector<128x128xf32>
    %c0_8 = arith.constant 0 : index
    %c0_9 = arith.constant 0 : index
    %14 = vector.load %arg2[%c0_8, %c0_9] : memref<128x128xbf16, #tpu.memory_space<vmem>>, vector<128x128xbf16>
    %15 = arith.extf %14 : vector<128x128xbf16> to vector<128x128xf32>
    %16 = arith.addf %13, %15 : vector<128x128xf32>
    %17 = arith.truncf %16 : vector<128x128xf32> to vector<128x128xbf16>
    %c0_10 = arith.constant 0 : index
    %c0_11 = arith.constant 0 : index
    %18 = vector.load %arg7[%c0_10, %c0_11] : memref<128x128xbf16, #tpu.memory_space<vmem>>, vector<128x128xbf16>
    tpu.vector_store %arg7[%c0_10, %c0_11], %17 {strides = array<i32>} : memref<128x128xbf16, #tpu.memory_space<vmem>>, vector<128x128xbf16>,
    %c0_12 = arith.constant 0 : index
    %c0_13 = arith.constant 0 : index
    %19 = vector.load %arg6[%c0_12, %c0_13] : memref<8x128xf32, #tpu.memory_space<vmem>>, vector<8x128xf32>
    %cst_14 = arith.constant dense<0.000000e+00> : vector<8x128xf32>
    %20 = tpu.matmul %19, %16, %cst_14 {dimension_numbers = #tpu.dot_dimension_numbers<[1], [0], [0], [1], [0, 0, 1, 1], [], []>} : vector<8x128xf32>, vector<128x128xf32>, vector<8x128xf32> -> vector<8x128xf32>
    %c0_15 = arith.constant 0 : index
    %c0_16 = arith.constant 0 : index
    %c0_17 = arith.constant 0 : index
    %21 = vector.load %arg8[%c0_15, %c0_16, %c0_17] : memref<1x8x128xf32, #tpu.memory_space<vmem>>, vector<1x8x128xf32>
    %22 = vector.shape_cast %21 : vector<1x8x128xf32> to vector<8x128xf32>
    %23 = vector.shape_cast %20 : vector<8x128xf32> to vector<1x8x128xf32>
    tpu.vector_store %arg8[%c0_15, %c0_16, %c0_17], %23 {strides = array<i32>} : memref<1x8x128xf32, #tpu.memory_space<vmem>>, vector<1x8x128xf32>,
    return
  }
  func.func @transform_0(%arg0: i32) -> (i32, i32) {
    %c0_i32 = arith.constant 0 : i32
    %c0_i32_0 = arith.constant 0 : i32
    return %arg0, %c0_i32 : i32, i32
  }
  func.func @transform_1(%arg0: i32) -> (i32, i32) {
    %c0_i32 = arith.constant 0 : i32
    %c0_i32_0 = arith.constant 0 : i32
    return %arg0, %c0_i32 : i32, i32
  }
  func.func @transform_2(%arg0: i32) -> (i32, i32) {
    %c0_i32 = arith.constant 0 : i32
    %c0_i32_0 = arith.constant 0 : i32
    return %arg0, %c0_i32 : i32, i32
  }
  func.func @transform_3(%arg0: i32) -> (i32, i32) {
    %c0_i32 = arith.constant 0 : i32
    %c0_i32_0 = arith.constant 0 : i32
    %c0_i32_1 = arith.constant 0 : i32
    return %c0_i32, %c0_i32_0 : i32, i32
  }
  func.func @transform_4(%arg0: i32) -> (i32, i32) {
    %c0_i32 = arith.constant 0 : i32
    %c0_i32_0 = arith.constant 0 : i32
    %c0_i32_1 = arith.constant 0 : i32
    return %c0_i32, %c0_i32_0 : i32, i32
  }
  func.func @transform_5(%arg0: i32) -> (i32, i32) {
    %c0_i32 = arith.constant 0 : i32
    %c0_i32_0 = arith.constant 0 : i32
    return %c0_i32, %arg0 : i32, i32
  }
  func.func @transform_6(%arg0: i32) -> (i32, i32) {
    %c0_i32 = arith.constant 0 : i32
    %c0_i32_0 = arith.constant 0 : i32
    return %arg0, %c0_i32 : i32, i32
  }
  func.func @transform_7(%arg0: i32) -> (i32, i32, i32) {
    %c0_i32 = arith.constant 0 : i32
    %c0_i32_0 = arith.constant 0 : i32
    %c0_i32_1 = arith.constant 0 : i32
    return %arg0, %c0_i32, %c0_i32_0 : i32, i32, i32
  }
}

module attributes {stable_mosaic.version = 11 : i64} {
  func.func @conv_stats_kernel(%arg0: i32, %arg1: i32, %arg2: memref<128x256xbf16, #tpu.memory_space<vmem>>, %arg3: memref<256x128xbf16, #tpu.memory_space<vmem>>, %arg4: memref<128x128xbf16, #tpu.memory_space<vmem>>, %arg5: memref<1x128xf32, #tpu.memory_space<vmem>>, %arg6: memref<8x128xf32, #tpu.memory_space<vmem>>, %arg7: memref<128x128xbf16, #tpu.memory_space<vmem>>, %arg8: memref<1x8x256xf32, #tpu.memory_space<vmem>>, %arg9: memref<128x128xf32, #tpu.memory_space<vmem>>) attributes {dimension_semantics = [#tpu.dimension_semantics<parallel>, #tpu.dimension_semantics<arbitrary>], iteration_bounds = array<i64: 2, 1>, scalar_prefetch = 0 : i64, scratch_operands = 1 : i64, tpu.core_type = #tpu.core_type<tc>, window_params = [{transform_indices = @transform_0, window_bounds = array<i64: 128, 256>}, {transform_indices = @transform_1, window_bounds = array<i64: 256, 128>}, {pipeline_mode = #tpu.pipeline_mode<synchronous>, transform_indices = @transform_2, window_bounds = array<i64: 128, 128>}, {pipeline_mode = #tpu.pipeline_mode<synchronous>, transform_indices = @transform_3, window_bounds = array<i64: 1, 128>}, {transform_indices = @transform_4, window_bounds = array<i64: 8, 128>}, {transform_indices = @transform_5, window_bounds = array<i64: 128, 128>}, {transform_indices = @transform_6, window_bounds = array<i64: 1, 8, 256>}]} {
    %c0_i32 = arith.constant 0 : i32
    %0 = arith.cmpi eq, %arg1, %c0_i32 : i32
    %1 = arith.extui %0 : i1 to i32
    %c0_i32_0 = arith.constant 0 : i32
    %2 = arith.cmpi ne, %1, %c0_i32_0 : i32
    scf.if %2 {
      %cst_10 = arith.constant 0.000000e+00 : f32
      %12 = vector.broadcast %cst_10 : f32 to vector<128x128xf32>
      %c0_11 = arith.constant 0 : index
      %c0_12 = arith.constant 0 : index
      %13 = vector.load %arg9[%c0_11, %c0_12] : memref<128x128xf32, #tpu.memory_space<vmem>>, vector<128x128xf32>
      tpu.vector_store %arg9[%c0_11, %c0_12], %12 {strides = array<i32>} : memref<128x128xf32, #tpu.memory_space<vmem>>, vector<128x128xf32>,
    } else {
    }
    %c0 = arith.constant 0 : index
    %c0_1 = arith.constant 0 : index
    %3 = vector.load %arg9[%c0, %c0_1] : memref<128x128xf32, #tpu.memory_space<vmem>>, vector<128x128xf32>
    %c0_2 = arith.constant 0 : index
    %c0_3 = arith.constant 0 : index
    %4 = vector.load %arg2[%c0_2, %c0_3] : memref<128x256xbf16, #tpu.memory_space<vmem>>, vector<128x256xbf16>
    %c0_4 = arith.constant 0 : index
    %c0_5 = arith.constant 0 : index
    %5 = vector.load %arg3[%c0_4, %c0_5] : memref<256x128xbf16, #tpu.memory_space<vmem>>, vector<256x128xbf16>
    %cst = arith.constant dense<0.000000e+00> : vector<128x128xf32>
    %6 = tpu.matmul %4, %5, %cst {dimension_numbers = #tpu.dot_dimension_numbers<[1], [0], [0], [1], [0, 0, 1, 1], [], []>} : vector<128x256xbf16>, vector<256x128xbf16>, vector<128x128xf32> -> vector<128x128xf32>
    %7 = arith.addf %3, %6 : vector<128x128xf32>
    %c0_6 = arith.constant 0 : index
    %c0_7 = arith.constant 0 : index
    %8 = vector.load %arg9[%c0_6, %c0_7] : memref<128x128xf32, #tpu.memory_space<vmem>>, vector<128x128xf32>
    tpu.vector_store %arg9[%c0_6, %c0_7], %7 {strides = array<i32>} : memref<128x128xf32, #tpu.memory_space<vmem>>, vector<128x128xf32>,
    %c0_i32_8 = arith.constant 0 : i32
    %9 = arith.cmpi eq, %arg1, %c0_i32_8 : i32
    %10 = arith.extui %9 : i1 to i32
    %c0_i32_9 = arith.constant 0 : i32
    %11 = arith.cmpi ne, %10, %c0_i32_9 : i32
    scf.if %11 {
      %c0_10 = arith.constant 0 : index
      %c0_11 = arith.constant 0 : index
      %12 = vector.load %arg9[%c0_10, %c0_11] : memref<128x128xf32, #tpu.memory_space<vmem>>, vector<128x128xf32>
      %13 = arith.truncf %12 : vector<128x128xf32> to vector<128x128xbf16>
      %c0_12 = arith.constant 0 : index
      %c0_13 = arith.constant 0 : index
      %14 = vector.load %arg4[%c0_12, %c0_13] : memref<128x128xbf16, #tpu.memory_space<vmem>>, vector<128x128xbf16>
      %cst_14 = arith.constant dense<0.000000e+00> : vector<128x128xf32>
      %15 = tpu.matmul %13, %14, %cst_14 {dimension_numbers = #tpu.dot_dimension_numbers<[1], [0], [0], [1], [0, 0, 1, 1], [], []>} : vector<128x128xbf16>, vector<128x128xbf16>, vector<128x128xf32> -> vector<128x128xf32>
      %c0_15 = arith.constant 0 : index
      %c0_16 = arith.constant 0 : index
      %16 = vector.load %arg5[%c0_15, %c0_16] : memref<1x128xf32, #tpu.memory_space<vmem>>, vector<1x128xf32>
      %17 = vector.broadcast %16 : vector<1x128xf32> to vector<128x128xf32>
      %18 = arith.addf %15, %17 : vector<128x128xf32>
      %19 = arith.truncf %18 : vector<128x128xf32> to vector<128x128xbf16>
      %c0_17 = arith.constant 0 : index
      %c0_18 = arith.constant 0 : index
      %20 = vector.load %arg7[%c0_17, %c0_18] : memref<128x128xbf16, #tpu.memory_space<vmem>>, vector<128x128xbf16>
      tpu.vector_store %arg7[%c0_17, %c0_18], %19 {strides = array<i32>} : memref<128x128xbf16, #tpu.memory_space<vmem>>, vector<128x128xbf16>,
      %21 = arith.mulf %18, %18 : vector<128x128xf32>
      %22 = tpu.concatenate %18, %21 in 1 : vector<128x128xf32>, vector<128x128xf32> -> vector<128x256xf32>
      %c0_19 = arith.constant 0 : index
      %c0_20 = arith.constant 0 : index
      %23 = vector.load %arg6[%c0_19, %c0_20] : memref<8x128xf32, #tpu.memory_space<vmem>>, vector<8x128xf32>
      %cst_21 = arith.constant dense<0.000000e+00> : vector<8x256xf32>
      %24 = tpu.matmul %23, %22, %cst_21 {dimension_numbers = #tpu.dot_dimension_numbers<[1], [0], [0], [1], [0, 0, 1, 1], [], []>} : vector<8x128xf32>, vector<128x256xf32>, vector<8x256xf32> -> vector<8x256xf32>
      %c0_22 = arith.constant 0 : index
      %c0_23 = arith.constant 0 : index
      %c0_24 = arith.constant 0 : index
      %25 = vector.load %arg8[%c0_22, %c0_23, %c0_24] : memref<1x8x256xf32, #tpu.memory_space<vmem>>, vector<1x8x256xf32>
      %26 = vector.shape_cast %25 : vector<1x8x256xf32> to vector<8x256xf32>
      %27 = vector.shape_cast %24 : vector<8x256xf32> to vector<1x8x256xf32>
      tpu.vector_store %arg8[%c0_22, %c0_23, %c0_24], %27 {strides = array<i32>} : memref<1x8x256xf32, #tpu.memory_space<vmem>>, vector<1x8x256xf32>,
    } else {
    }
    return
  }
  func.func @transform_0(%arg0: i32, %arg1: i32) -> (i32, i32) {
    %c0_i32 = arith.constant 0 : i32
    return %arg0, %arg1 : i32, i32
  }
  func.func @transform_1(%arg0: i32, %arg1: i32) -> (i32, i32) {
    %c0_i32 = arith.constant 0 : i32
    %c0_i32_0 = arith.constant 0 : i32
    return %arg1, %c0_i32 : i32, i32
  }
  func.func @transform_2(%arg0: i32, %arg1: i32) -> (i32, i32) {
    %c0_i32 = arith.constant 0 : i32
    %c0_i32_0 = arith.constant 0 : i32
    %c0_i32_1 = arith.constant 0 : i32
    return %c0_i32, %c0_i32_0 : i32, i32
  }
  func.func @transform_3(%arg0: i32, %arg1: i32) -> (i32, i32) {
    %c0_i32 = arith.constant 0 : i32
    %c0_i32_0 = arith.constant 0 : i32
    %c0_i32_1 = arith.constant 0 : i32
    return %c0_i32, %c0_i32_0 : i32, i32
  }
  func.func @transform_4(%arg0: i32, %arg1: i32) -> (i32, i32) {
    %c0_i32 = arith.constant 0 : i32
    %c0_i32_0 = arith.constant 0 : i32
    return %c0_i32, %arg0 : i32, i32
  }
  func.func @transform_5(%arg0: i32, %arg1: i32) -> (i32, i32) {
    %c0_i32 = arith.constant 0 : i32
    %c0_i32_0 = arith.constant 0 : i32
    return %arg0, %c0_i32 : i32, i32
  }
  func.func @transform_6(%arg0: i32, %arg1: i32) -> (i32, i32, i32) {
    %c0_i32 = arith.constant 0 : i32
    %c0_i32_0 = arith.constant 0 : i32
    %c0_i32_1 = arith.constant 0 : i32
    return %arg0, %c0_i32, %c0_i32_0 : i32, i32, i32
  }
}

module attributes {stable_mosaic.version = 11 : i64} {
  func.func @norm_relu_residual_pool_kernel(%arg0: i32, %arg1: memref<128x128xbf16, #tpu.memory_space<vmem>>, %arg2: memref<128x128xbf16, #tpu.memory_space<vmem>>, %arg3: memref<128x8xf32, #tpu.memory_space<vmem>>, %arg4: memref<8x256xf32, #tpu.memory_space<vmem>>, %arg5: memref<1x128xf32, #tpu.memory_space<vmem>>, %arg6: memref<8x128xf32, #tpu.memory_space<vmem>>, %arg7: memref<128x128xbf16, #tpu.memory_space<vmem>>, %arg8: memref<1x8x128xf32, #tpu.memory_space<vmem>>) attributes {dimension_semantics = [#tpu.dimension_semantics<parallel>], iteration_bounds = array<i64: 2>, scalar_prefetch = 0 : i64, scratch_operands = 0 : i64, tpu.core_type = #tpu.core_type<tc>, window_params = [{transform_indices = @transform_0, window_bounds = array<i64: 128, 128>}, {transform_indices = @transform_1, window_bounds = array<i64: 128, 128>}, {transform_indices = @transform_2, window_bounds = array<i64: 128, 8>}, {pipeline_mode = #tpu.pipeline_mode<synchronous>, transform_indices = @transform_3, window_bounds = array<i64: 8, 256>}, {pipeline_mode = #tpu.pipeline_mode<synchronous>, transform_indices = @transform_4, window_bounds = array<i64: 1, 128>}, {transform_indices = @transform_5, window_bounds = array<i64: 8, 128>}, {transform_indices = @transform_6, window_bounds = array<i64: 128, 128>}, {transform_indices = @transform_7, window_bounds = array<i64: 1, 8, 128>}]} {
    %c0 = arith.constant 0 : index
    %c0_0 = arith.constant 0 : index
    %0 = vector.load %arg3[%c0, %c0_0] : memref<128x8xf32, #tpu.memory_space<vmem>>, vector<128x8xf32>
    %c0_1 = arith.constant 0 : index
    %c0_2 = arith.constant 0 : index
    %1 = vector.load %arg4[%c0_1, %c0_2] : memref<8x256xf32, #tpu.memory_space<vmem>>, vector<8x256xf32>
    %cst = arith.constant dense<0.000000e+00> : vector<128x256xf32>
    %2 = tpu.matmul %0, %1, %cst {dimension_numbers = #tpu.dot_dimension_numbers<[1], [0], [0], [1], [0, 0, 1, 1], [], []>} : vector<128x8xf32>, vector<8x256xf32>, vector<128x256xf32> -> vector<128x256xf32>
    %3 = vector.extract_strided_slice %2 {offsets = [0, 0], sizes = [128, 128], strides = [1, 1]} : vector<128x256xf32> to vector<128x128xf32>
    %4 = vector.extract_strided_slice %2 {offsets = [0, 128], sizes = [128, 128], strides = [1, 1]} : vector<128x256xf32> to vector<128x128xf32>
    %c0_3 = arith.constant 0 : index
    %c0_4 = arith.constant 0 : index
    %5 = vector.load %arg1[%c0_3, %c0_4] : memref<128x128xbf16, #tpu.memory_space<vmem>>, vector<128x128xbf16>
    %6 = arith.extf %5 : vector<128x128xbf16> to vector<128x128xf32>
    %7 = arith.subf %6, %3 : vector<128x128xf32>
    %8 = arith.mulf %7, %4 : vector<128x128xf32>
    %c0_5 = arith.constant 0 : index
    %c0_6 = arith.constant 0 : index
    %9 = vector.load %arg5[%c0_5, %c0_6] : memref<1x128xf32, #tpu.memory_space<vmem>>, vector<1x128xf32>
    %10 = vector.broadcast %9 : vector<1x128xf32> to vector<128x128xf32>
    %11 = arith.addf %8, %10 : vector<128x128xf32>
    %cst_7 = arith.constant 0.000000e+00 : f32
    %12 = vector.broadcast %cst_7 : f32 to vector<128x128xf32>
    %13 = arith.maximumf %11, %12 : vector<128x128xf32>
    %c0_8 = arith.constant 0 : index
    %c0_9 = arith.constant 0 : index
    %14 = vector.load %arg2[%c0_8, %c0_9] : memref<128x128xbf16, #tpu.memory_space<vmem>>, vector<128x128xbf16>
    %15 = arith.extf %14 : vector<128x128xbf16> to vector<128x128xf32>
    %16 = arith.addf %13, %15 : vector<128x128xf32>
    %17 = arith.truncf %16 : vector<128x128xf32> to vector<128x128xbf16>
    %c0_10 = arith.constant 0 : index
    %c0_11 = arith.constant 0 : index
    %18 = vector.load %arg7[%c0_10, %c0_11] : memref<128x128xbf16, #tpu.memory_space<vmem>>, vector<128x128xbf16>
    tpu.vector_store %arg7[%c0_10, %c0_11], %17 {strides = array<i32>} : memref<128x128xbf16, #tpu.memory_space<vmem>>, vector<128x128xbf16>,
    %c0_12 = arith.constant 0 : index
    %c0_13 = arith.constant 0 : index
    %19 = vector.load %arg6[%c0_12, %c0_13] : memref<8x128xf32, #tpu.memory_space<vmem>>, vector<8x128xf32>
    %cst_14 = arith.constant dense<0.000000e+00> : vector<8x128xf32>
    %20 = tpu.matmul %19, %16, %cst_14 {dimension_numbers = #tpu.dot_dimension_numbers<[1], [0], [0], [1], [0, 0, 1, 1], [], []>} : vector<8x128xf32>, vector<128x128xf32>, vector<8x128xf32> -> vector<8x128xf32>
    %c0_15 = arith.constant 0 : index
    %c0_16 = arith.constant 0 : index
    %c0_17 = arith.constant 0 : index
    %21 = vector.load %arg8[%c0_15, %c0_16, %c0_17] : memref<1x8x128xf32, #tpu.memory_space<vmem>>, vector<1x8x128xf32>
    %22 = vector.shape_cast %21 : vector<1x8x128xf32> to vector<8x128xf32>
    %23 = vector.shape_cast %20 : vector<8x128xf32> to vector<1x8x128xf32>
    tpu.vector_store %arg8[%c0_15, %c0_16, %c0_17], %23 {strides = array<i32>} : memref<1x8x128xf32, #tpu.memory_space<vmem>>, vector<1x8x128xf32>,
    return
  }
  func.func @transform_0(%arg0: i32) -> (i32, i32) {
    %c0_i32 = arith.constant 0 : i32
    %c0_i32_0 = arith.constant 0 : i32
    return %arg0, %c0_i32 : i32, i32
  }
  func.func @transform_1(%arg0: i32) -> (i32, i32) {
    %c0_i32 = arith.constant 0 : i32
    %c0_i32_0 = arith.constant 0 : i32
    return %arg0, %c0_i32 : i32, i32
  }
  func.func @transform_2(%arg0: i32) -> (i32, i32) {
    %c0_i32 = arith.constant 0 : i32
    %c0_i32_0 = arith.constant 0 : i32
    return %arg0, %c0_i32 : i32, i32
  }
  func.func @transform_3(%arg0: i32) -> (i32, i32) {
    %c0_i32 = arith.constant 0 : i32
    %c0_i32_0 = arith.constant 0 : i32
    %c0_i32_1 = arith.constant 0 : i32
    return %c0_i32, %c0_i32_0 : i32, i32
  }
  func.func @transform_4(%arg0: i32) -> (i32, i32) {
    %c0_i32 = arith.constant 0 : i32
    %c0_i32_0 = arith.constant 0 : i32
    %c0_i32_1 = arith.constant 0 : i32
    return %c0_i32, %c0_i32_0 : i32, i32
  }
  func.func @transform_5(%arg0: i32) -> (i32, i32) {
    %c0_i32 = arith.constant 0 : i32
    %c0_i32_0 = arith.constant 0 : i32
    return %c0_i32, %arg0 : i32, i32
  }
  func.func @transform_6(%arg0: i32) -> (i32, i32) {
    %c0_i32 = arith.constant 0 : i32
    %c0_i32_0 = arith.constant 0 : i32
    return %arg0, %c0_i32 : i32, i32
  }
  func.func @transform_7(%arg0: i32) -> (i32, i32, i32) {
    %c0_i32 = arith.constant 0 : i32
    %c0_i32_0 = arith.constant 0 : i32
    %c0_i32_1 = arith.constant 0 : i32
    return %arg0, %c0_i32, %c0_i32_0 : i32, i32, i32
  }
}

</mosaic_0001>

<bundles_post_ra>
// kernel: gcn_net_forward.5
= control target key start
LH: loop header
LB: loop body
LE: loop exit
PB: predicated region body
PF: predicated region fallthrough
CT: control target
= control target key end

     0   :  { %13 = vsyncpa [#allocation3], 0  ;;  %s1667_s0 = inlined_call_operand.vmem [shape: bf16[256,128], index: 0, kind: input, shape index: {}]   ;;  %s1668_s1 = inlined_call_operand.vmem [shape: bf16[256,128], index: 1, kind: input, shape index: {}]   ;;  %s1669_s2 = inlined_call_operand.vmem [shape: f32[256,8], index: 2, kind: input, shape index: {}]   ;;  %s1670_s3 = inlined_call_operand.vmem [shape: f32[8,256], index: 3, kind: input, shape index: {}]   ;;  %s1671_s4 = inlined_call_operand.vmem [shape: f32[1,128], index: 4, kind: input, shape index: {}]   ;;  %s1672_s5 = inlined_call_operand.vmem [shape: f32[8,256], index: 5, kind: input, shape index: {}]   ;;  %s1673_s6 = inlined_call_operand.vmem [shape: bf16[256,128], index: 6, kind: output, shape index: {0}]   ;;  %s1674_s7 = inlined_call_operand.hbm [shape: f32[2,8,128], index: 7, kind: output, shape index: {1}]  }
   0x1   :  { %15 = vsyncpa [#allocation3 + $0x1], 0  ;;  %s1446_s24 = smov 0   ;;  %s1448_s25 = smov 0  }
   0x2   :  { %s1450_s26 = smov 0   ;;  %s1452_s27 = smov 0  }
   0x3 LB: > { %s1467_s28 = sadd.s32 4294967295, %s1400_s27   ;;  %s1028_s29 = sadd.s32 4294967294, %s1400_s27   ;;  %s1400_s27 = sphi %s1452_s27, %s1680_s27   ;;  %s1396_s26 = sphi %s1450_s26, %s1679_s26   ;;  %s1392_s25 = sphi %s1448_s25, %s1678_s25   ;;  %s1388_s24 = sphi %s1446_s24, %s1677_s24  }
   0x4   : > { %s1471_s30 = sadd.s32 1, %s1400_s27   ;;  %s200_s8 = sadd.s32 1, %s1396_s26 }
   0x5   : > { %s197_s9 = ssub.s32 %s1400_s27, %s1471_s30  ;;  %p210_p0 = scmp.ne.s32.totalorder %s1396_s26, %s1392_s25 }
   0x6   : > { %p198_p1 = scmp.eq.s32.totalorder %s197_s9, 0  ;;  %p211_p2 = scmp.eq.s32.totalorder %s1467_s28, 1 }
   0x7   : > { %p216_p3 = scmp.ne.s32.totalorder %s1392_s25, %s1388_s24  ;;  %p217_p4 = scmp.eq.s32.totalorder %s1028_s29, 1 }
   0x8   : > { %s1482_s10 = scalar_select %p198_p1, %s1396_s26, %s200_s8  }
   0x9   : > { %p1484_p5 = por %p211_p2, %p210_p0  ;;  %p1488_p6 = por %p217_p4, %p216_p3 }
   0xa   : > { %p1031_p7 = scmp.ge.s32.totalorder %s1400_s27, 1  ;;  %p275_p8 = scmp.lt.s32.totalorder %s1400_s27, 3 }
   0xc   : > { %p276_p9 = pnand %p1031_p7, %p275_p8 }
   0xd   : > { %v371_v0 = vld [vmem:[%s1670_s3 + $0x8] sm:$0xff] (!%p276_p9)  ;;  %v370_v1 = vld [vmem:[%s1670_s3] sm:$0xff] (!%p276_p9)  ;;  %s1033_s17 = sshll.u32 (!%p276_p9), %s1467_s28, 4  ;;  %v1402_v2 = vmov (!%p276_p9), 0.0   ;;  %vm372_vm0 = vcmask (!%p276_p9), 64512   ;;  %v1403_v19 = vmov (!%p276_p9), 0.0|0.0  }
   0xe   : > { %279 = sbr.rel (%p276_p9) target bundleno = 538 (0x21a), region = 44  ;;  %421 = vmatprep.subr.mxu0 (!%p276_p9), %v371_v0  ;;  %485 = vmatprep.mubr.f32.mxu0 (!%p276_p9), %v1402_v2  ;;  %p327_p10 = scmp.lt.s32.totalorder (!%p276_p9), %s1033_s17, 31  ;;  %vm1404_vm1 = vmmov (!%p276_p9), 0   ;;  %v1561_v26 = vld [vmem:[%s1671_s4] ss:$0 sm:$0xff] (!%p276_p9) }
   0xf   : > { %422 = vmatpush1.msra.mxu0 (!%p276_p9), %v370_v1  ;;  %1272 = vmatprep.subr.bf16.mxu1 (!%p276_p9), %v1403_v19  ;;  %p344_p11 = scmp.lt.s32.totalorder (!%p276_p9), %s1467_s28, 1  ;;  %s1076_s15 = sshll.u32 (!%p276_p9), %s1467_s28, 7 }
  0x10   : > { %1269 = vmatprep.mubr.msk.f32.mxu1 (!%p276_p9), %vm1404_vm1, %v1402_v2 }
  0x15   : > { %s1682_s17 = smov (!%p327_p10, %s1033_s17), 31 }
  0x16   : > { %s1038_s18 = sshll.u32 %s1682_s17, 3  ;;  %s1543_s22 = sshll.u32 %s1682_s17, 2 }
  0x17   : > { %s1507_s21 = scalar_lea.vmem %s1669_s2, %s1038_s18  ;;  %s1549_s8 = scalar_lea.vmem %s1667_s0, %s1543_s22 }
  0x18   : > { %v354_v3 = vld [vmem:[%s1507_s21] sm:$0xff]  ;;  %v355_v4 = vld [vmem:[%s1507_s21 + $0x8] sm:$0xff]  ;;  %v356_v5 = vld [vmem:[%s1507_s21 + $0x10] sm:$0xff]  ;;  %s1556_s14 = scalar_lea.vmem %s1668_s1, %s1543_s22  ;;  %s1574_s19 = scalar_lea.vmem %s1673_s6, %s1543_s22 }
  0x19   : > { %1042 = vmatmul.mubr.msk.f32.vlgmr.msra.gmra.mrb[0].mxu0 %vm372_vm0, %v354_v3  ;;  %v357_v6 = vld [vmem:[%s1507_s21 + $0x18] sm:$0xff]  ;;  %v358_v7 = vld [vmem:[%s1507_s21 + $0x20] sm:$0xff]  ;;  %v359_v8 = vld [vmem:[%s1507_s21 + $0x28] sm:$0xff]  ;;  %s345_s20 = scalar_select %p344_p11, %s1467_s28, 1 }
  0x1a   : > { %491 = vmatprep.mubr.f32.mxu0 %v1402_v2  ;;  %v360_v9 = vld [vmem:[%s1507_s21 + $0x30] sm:$0xff]  ;;  %v361_v10 = vld [vmem:[%s1507_s21 + $0x38] sm:$0xff]  ;;  %v362_v11 = vld [vmem:[%s1507_s21 + $0x40] sm:$0xff]  ;;  %s1627_s18 = scalar_lea.hbm %s1674_s7, %s1076_s15  ;;  %s1405_s28 = smov [#allocation2]  }
  0x1b   : > { %v363_v12 = vld [vmem:[%s1507_s21 + $0x48] sm:$0xff]  ;;  %v364_v13 = vld [vmem:[%s1507_s21 + $0x50] sm:$0xff]  ;;  %v365_v14 = vld [vmem:[%s1507_s21 + $0x58] sm:$0xff] }
  0x1c   : > { %v366_v15 = vld [vmem:[%s1507_s21 + $0x60] sm:$0xff]  ;;  %v367_v16 = vld [vmem:[%s1507_s21 + $0x68] sm:$0xff]  ;;  %v368_v17 = vld [vmem:[%s1507_s21 + $0x70] sm:$0xff] }
  0x1d   : > { %1043 = vmatmul.mubr.msk.f32.gmra.mrb[2].mxu0 %vm372_vm0, %v355_v4  ;;  %v369_v18 = vld [vmem:[%s1507_s21 + $0x78] sm:$0xff]  ;;  %v1096_v20 = vld [vmem:[%s1549_s8] sm:$0xff]   ;;  %v1199_v27 = vld [vmem:[%s1549_s8 + $0x8] sm:$0xff]   ;;  %s1039_s21 = sshll.u32 %s345_s20, 3 }
  0x1e   : > { %497 = vmatprep.mubr.f32.mxu0 %v1402_v2  ;;  %v1097_v21 = vunpack.c.l.bf16 %v1096_v20  ;;  %v1098_v25 = vunpack.c.h.bf16 %v1096_v20  ;;  %v1128_v28 = vld [vmem:[%s1556_s14] sm:$0xff]   ;;  %v1101_v34 = vunpack.c.l.bf16 %v1199_v27  ;;  %v1102_v39 = vunpack.c.h.bf16 %v1199_v27  ;;  %v1206_v43 = vld [vmem:[%s1556_s14 + $0x8] sm:$0xff]   ;;  %v1200_v46 = vld [vmem:[%s1549_s8 + $0x10] sm:$0xff]   ;;  %s347_s29 = scalar_lea.vmem %s1672_s5, %s1039_s21  ;;  %s1342_s21 = sshll.u32 %s1405_s28, 4  ;;  %s1343_s21 = int_to_ptr.vmem [resolvable:$false] %s1342_s21 }
  0x1f   : > { %v1129_v35 = vunpack.c.l.bf16 %v1128_v28  ;;  %v1130_v44 = vunpack.c.h.bf16 %v1128_v28  ;;  %v1133_v49 = vunpack.c.l.bf16 %v1206_v43  ;;  %v1105_v54 = vunpack.c.l.bf16 %v1200_v46  ;;  %v1207_v1 = vld [vmem:[%s1556_s14 + $0x10] sm:$0xff]   ;;  %v1201_v3 = vld [vmem:[%s1549_s8 + $0x18] sm:$0xff]   ;;  %s1344_s22 = scalar_lea.vmem %s1343_s21, 256 }
  0x20   : > { %v1134_v59 = vunpack.c.h.bf16 %v1206_v43 }
  0x21   : > { %1044 = vmatmul.mubr.msk.f32.gmra.mrb[4].mxu0 %vm372_vm0, %v356_v5 }
  0x22   : > { %503 = vmatprep.mubr.f32.mxu0 %v1402_v2 }
  0x25   : > { %1045 = vmatmul.mubr.msk.f32.gmra.mrb[6].mxu0 %vm372_vm0, %v357_v6  ;;  %v1137_v6 = vunpack.c.l.bf16 %v1207_v1 }
  0x26   : > { %509 = vmatprep.mubr.f32.mxu0 %v1402_v2 }
  0x29   : > { %1046 = vmatmul.mubr.msk.f32.gmra.mrb[8].mxu0 %vm372_vm0, %v358_v7 }
  0x2a   : > { %515 = vmatprep.mubr.f32.mxu0 %v1402_v2 }
  0x2d   : > { %1047 = vmatmul.mubr.msk.f32.gmra.mrb[10].mxu0 %vm372_vm0, %v359_v8 }
  0x2e   : > { %521 = vmatprep.mubr.f32.mxu0 %v1402_v2 }
  0x31   : > { %1048 = vmatmul.mubr.msk.f32.gmra.mrb[12].mxu0 %vm372_vm0, %v360_v9 }
  0x32   : > { %527 = vmatprep.mubr.f32.mxu0 %v1402_v2 }
  0x35   : > { %1049 = vmatmul.mubr.msk.f32.gmra.mrb[14].mxu0 %vm372_vm0, %v361_v10 }
  0x36   : > { %533 = vmatprep.mubr.f32.mxu0 %v1402_v2 }
  0x39   : > { %1050 = vmatmul.mubr.msk.f32.gmra.mrb[16].mxu0 %vm372_vm0, %v362_v11 }
  0x3a   : > { %539 = vmatprep.mubr.f32.mxu0 %v1402_v2 }
  0x3d   : > { %1051 = vmatmul.mubr.msk.f32.gmra.mrb[18].mxu0 %vm372_vm0, %v363_v12  ;;  %v1109_v12 = vunpack.c.l.bf16 %v1201_v3 }
  0x3e   : > { %545 = vmatprep.mubr.f32.mxu0 %v1402_v2 }
  0x41   : > { %1052 = vmatmul.mubr.msk.f32.gmra.mrb[20].mxu0 %vm372_vm0, %v364_v13 }
  0x42   : > { %551 = vmatprep.mubr.f32.mxu0 %v1402_v2 }
  0x45   : > { %1053 = vmatmul.mubr.msk.f32.gmra.mrb[22].mxu0 %vm372_vm0, %v365_v14 }
  0x46   : > { %557 = vmatprep.mubr.f32.mxu0 %v1402_v2 }
  0x49   : > { %1054 = vmatmul.mubr.msk.f32.gmra.mrb[24].mxu0 %vm372_vm0, %v366_v15 }
  0x4a   : > { %563 = vmatprep.mubr.f32.mxu0 %v1402_v2 }
  0x4d   : > { %1055 = vmatmul.mubr.msk.f32.gmra.mrb[26].mxu0 %vm372_vm0, %v367_v16  ;;  %v1138_v16 = vunpack.c.h.bf16 %v1207_v1 }
  0x4e   : > { %569 = vmatprep.mubr.f32.mxu0 %v1402_v2 }
  0x51   : > { %1056 = vmatmul.mubr.msk.f32.gmra.mrb[28].mxu0 %vm372_vm0, %v368_v17 }
  0x52   : > { %575 = vmatprep.mubr.f32.mxu0 %v1402_v2  ;;  %v1106_v2 = vunpack.c.h.bf16 %v1200_v46 }
  0x55   : > { %1057 = vmatmul.mubr.msk.f32.gmra.mrb[30].mxu0 %vm372_vm0, %v369_v18 }
  0xec   : > { %v487_v22 = vpop.f32.mrb[0].mxu0 }
  0xed   : > { %v614_v23 = vsub.f32 %v1097_v21, %v487_v22  ;;  %v489_v24 = vpop.f32.mrb[1].mxu0 }
  0xef   : > { %v630_v29 = vmul.f32 %v614_v23, %v489_v24  ;;  %v1208_v23 = vld [vmem:[%s1556_s14 + $0x18] sm:$0xff]   ;;  %v1110_v24 = vunpack.c.h.bf16 %v1201_v3 }
  0xf0   : > { %v493_v30 = vpop.f32.mrb[2].mxu0 }
  0xf1   : > { %v653_v31 = vadd.f32 %v1561_v26, %v630_v29  ;;  %v615_v32 = vsub.f32 %v1098_v25, %v493_v30  ;;  %v495_v33 = vpop.f32.mrb[3].mxu0  ;;  %v1202_v25 = vld [vmem:[%s1549_s8 + $0x20] sm:$0xff]   ;;  %v1141_v29 = vunpack.c.l.bf16 %v1208_v23 }
  0xf2   : > { %v1114_v46 = vunpack.c.h.bf16 %v1202_v25 }
  0xf3   : > { %v669_v36 = vmax.f32 %v653_v31, 0.0  ;;  %v631_v37 = vmul.f32 %v615_v32, %v495_v33 }
  0xf4   : > { %v499_v38 = vpop.f32.mrb[4].mxu0 }
  0xf5   : > { %v654_v40 = vadd.f32 %v1561_v26, %v631_v37  ;;  %v616_v41 = vsub.f32 %v1101_v34, %v499_v38  ;;  %v501_v42 = vpop.f32.mrb[5].mxu0  ;;  %v717_v45 = vadd.f32 %v1129_v35, %v669_v36  ;;  %v1113_v35 = vunpack.c.l.bf16 %v1202_v25 }
  0xf7   : > { %v670_v47 = vmax.f32 %v654_v40, 0.0  ;;  %v632_v48 = vmul.f32 %v616_v41, %v501_v42 }
  0xf8   : > { %v505_v50 = vpop.f32.mrb[6].mxu0 }
  0xf9   : > { %v655_v51 = vadd.f32 %v1561_v26, %v632_v48  ;;  %v617_v52 = vsub.f32 %v1102_v39, %v505_v50  ;;  %v507_v53 = vpop.f32.mrb[7].mxu0  ;;  %v718_v55 = vadd.f32 %v1130_v44, %v670_v47  ;;  %v1142_v39 = vunpack.c.h.bf16 %v1208_v23  ;;  %v1203_v47 = vld [vmem:[%s1549_s8 + $0x28] sm:$0xff]  }
  0xfa   : > { %v1118_v3 = vunpack.c.h.bf16 %v1203_v47 }
  0xfb   : > { %v671_v56 = vmax.f32 %v655_v51, 0.0  ;;  %v633_v57 = vmul.f32 %v617_v52, %v507_v53  ;;  %v1162_v58 = vpack.c.bf16 %v718_v55, %v717_v45  ;;  %v1209_v45 = vld [vmem:[%s1556_s14 + $0x20] sm:$0xff]  }
  0xfc   : > { %v511_v60 = vpop.f32.mrb[8].mxu0  ;;  %v1145_v50 = vunpack.c.l.bf16 %v1209_v45 }
  0xfd   : > { %v719_v61 = vadd.f32 %v1133_v49, %v671_v56  ;;  %v656_v62 = vadd.f32 %v1561_v26, %v633_v57  ;;  %v618_v63 = vsub.f32 %v1105_v54, %v511_v60  ;;  %v513_v0 = vpop.f32.mrb[9].mxu0  ;;  %1163 = vst [vmem:[%s1574_s19] sm:$0xff] %v1162_v58   ;;  %1274 = vmatpush3.bf16.msra.mxu1 %v1162_v58  ;;  %v1117_v56 = vunpack.c.l.bf16 %v1203_v47  ;;  %v1212_v47 = vld [vmem:[%s1556_s14 + $0x38] sm:$0xff]  }
  0xfe   : > { %1275 = vmatprep.subr.bf16.mxu1 %v1403_v19  ;;  %v1146_v60 = vunpack.c.h.bf16 %v1209_v45 }
  0xff   : > { %v672_v4 = vmax.f32 %v656_v62, 0.0  ;;  %v634_v5 = vmul.f32 %v618_v63, %v513_v0 }
 0x100   : > { %v517_v7 = vpop.f32.mrb[10].mxu0 }
 0x101   : > { %v720_v8 = vadd.f32 %v1134_v59, %v672_v4  ;;  %v657_v9 = vadd.f32 %v1561_v26, %v634_v5  ;;  %v619_v10 = vsub.f32 %v1106_v2, %v517_v7  ;;  %v519_v11 = vpop.f32.mrb[11].mxu0  ;;  %v1210_v2 = vld [vmem:[%s1556_s14 + $0x28] sm:$0xff]   ;;  %v1204_v4 = vld [vmem:[%s1549_s8 + $0x30] sm:$0xff]  }
 0x102   : > { %v1149_v7 = vunpack.c.l.bf16 %v1210_v2  ;;  %v1122_v25 = vunpack.c.h.bf16 %v1204_v4 }
 0x103   : > { %v673_v13 = vmax.f32 %v657_v9, 0.0  ;;  %v635_v14 = vmul.f32 %v619_v10, %v519_v11  ;;  %v1167_v15 = vpack.c.bf16 %v720_v8, %v719_v61 }
 0x104   : > { %v523_v17 = vpop.f32.mrb[12].mxu0 }
 0x105   : > { %v721_v18 = vadd.f32 %v1137_v6, %v673_v13  ;;  %v658_v20 = vadd.f32 %v1561_v26, %v635_v14  ;;  %v620_v21 = vsub.f32 %v1109_v12, %v523_v17  ;;  %v525_v22 = vpop.f32.mrb[13].mxu0  ;;  %1213 = vst [vmem:[%s1574_s19 + $0x8] sm:$0xff] %v1167_v15   ;;  %1277 = vmatpush3.bf16.msra.mxu1 %v1167_v15  ;;  %v1121_v13 = vunpack.c.l.bf16 %v1204_v4 }
 0x106   : > { %1278 = vmatprep.subr.bf16.mxu1 %v1403_v19  ;;  %v1150_v17 = vunpack.c.h.bf16 %v1210_v2 }
 0x107   : > { %v674_v27 = vmax.f32 %v658_v20, 0.0  ;;  %v636_v28 = vmul.f32 %v620_v21, %v525_v22 }
 0x108   : > { %v529_v30 = vpop.f32.mrb[14].mxu0 }
 0x109   : > { %v722_v31 = vadd.f32 %v1138_v16, %v674_v27  ;;  %v659_v32 = vadd.f32 %v1561_v26, %v636_v28  ;;  %v621_v33 = vsub.f32 %v1110_v24, %v529_v30  ;;  %v531_v34 = vpop.f32.mrb[15].mxu0  ;;  %v1211_v24 = vld [vmem:[%s1556_s14 + $0x30] sm:$0xff]   ;;  %v1205_v27 = vld [vmem:[%s1549_s8 + $0x38] sm:$0xff]   ;;  %s323_s8 = sand.u32 1, %s1392_s25  }
 0x10a   : > { %v1153_v30 = vunpack.c.l.bf16 %v1211_v24  ;;  %s1032_s9 = sshll.u32 %s323_s8, 3 }
 0x10b   : > { %v675_v36 = vmax.f32 %v659_v32, 0.0  ;;  %v637_v37 = vmul.f32 %v621_v33, %v531_v34  ;;  %v1172_v38 = vpack.c.bf16 %v722_v31, %v721_v18  ;;  %s325_s13 = scalar_lea.vmem [#allocation2], %s1032_s9 }
 0x10c   : > { %v535_v40 = vpop.f32.mrb[16].mxu0  ;;  %s908_s14 = sshll.u32 %s325_s13, 4  ;;  %s1622_s14 = int_to_ptr.vmem [resolvable:$true] %s908_s14 }
 0x10d   : > { %v723_v41 = vadd.f32 %v1141_v29, %v675_v36  ;;  %v660_v42 = vadd.f32 %v1561_v26, %v637_v37  ;;  %v622_v43 = vsub.f32 %v1113_v35, %v535_v40  ;;  %v537_v44 = vpop.f32.mrb[17].mxu0  ;;  %1214 = vst [vmem:[%s1574_s19 + $0x10] sm:$0xff] %v1172_v38   ;;  %1280 = vmatpush3.bf16.msra.mxu1 %v1172_v38  ;;  %v1125_v36 = vunpack.c.l.bf16 %v1205_v27  ;;  %s1338_s20 = scalar_lea.vmem %s1622_s14, 128  ;;  %p1345_p1 = scmp.lt.s32.totalorder %s1622_s14, %s1343_s21 }
 0x10e   : > { %1281 = vmatprep.subr.bf16.mxu1 %v1403_v19  ;;  %v1154_v40 = vunpack.c.h.bf16 %v1211_v24  ;;  %p1339_p12 = scmp.ne.s32.totalorder %s1622_s14, %s1338_s20  ;;  %p1346_p2 = scmp.lt.s32.totalorder %s1344_s22, %s1338_s20 }
 0x10f   : > { %v676_v48 = vmax.f32 %v660_v42, 0.0  ;;  %v638_v49 = vmul.f32 %v622_v43, %v537_v44 }
 0x110   : > { %v541_v51 = vpop.f32.mrb[18].mxu0  ;;  %p1340_p13 = pnand %p1339_p12, %p1484_p5  ;;  %p1347_p3 = por %p1346_p2, %p1345_p1 }
 0x111   : > { %v724_v52 = vadd.f32 %v1142_v39, %v676_v48  ;;  %v661_v53 = vadd.f32 %v1561_v26, %v638_v49  ;;  %v623_v54 = vsub.f32 %v1114_v46, %v541_v51  ;;  %v543_v55 = vpop.f32.mrb[19].mxu0  ;;  %v1126_v46 = vunpack.c.h.bf16 %v1205_v27 }
 0x112   : > { %p1341_p0 = pneg %p1340_p13 }
 0x113   : > { %v677_v57 = vmax.f32 %v661_v53, 0.0  ;;  %v639_v58 = vmul.f32 %v623_v54, %v543_v55  ;;  %v1177_v59 = vpack.c.bf16 %v724_v52, %v723_v41  ;;  %v1157_v53 = vunpack.c.l.bf16 %v1212_v47 }
 0x114   : > { %v547_v61 = vpop.f32.mrb[20].mxu0  ;;  %p1348_p4 = pnand %p1347_p3, %p1341_p0 }
 0x115   : > { %v725_v62 = vadd.f32 %v1145_v50, %v677_v57  ;;  %v662_v63 = vadd.f32 %v1561_v26, %v639_v58  ;;  %v624_v0 = vsub.f32 %v1117_v56, %v547_v61  ;;  %v549_v1 = vpop.f32.mrb[21].mxu0  ;;  %1215 = vst [vmem:[%s1574_s19 + $0x18] sm:$0xff] %v1177_v59   ;;  %1283 = vmatpush3.bf16.msra.mxu1 %v1177_v59  ;;  %v1158_v61 = vunpack.c.h.bf16 %v1212_v47 }
 0x116   : > { %1284 = vmatprep.subr.bf16.mxu1 %v1403_v19 }
 0x117   : > { %v678_v5 = vmax.f32 %v662_v63, 0.0  ;;  %v640_v6 = vmul.f32 %v624_v0, %v549_v1  ;;  %v813_v1 = vld [vmem:[%s347_s29] sm:$0xff] }
 0x118   : > { %v553_v8 = vpop.f32.mrb[22].mxu0 }
 0x119   : > { %v726_v9 = vadd.f32 %v1146_v60, %v678_v5  ;;  %v663_v10 = vadd.f32 %v1561_v26, %v640_v6  ;;  %v625_v11 = vsub.f32 %v1118_v3, %v553_v8  ;;  %v555_v12 = vpop.f32.mrb[23].mxu0 }
 0x11b   : > { %v679_v14 = vmax.f32 %v663_v10, 0.0  ;;  %v641_v15 = vmul.f32 %v625_v11, %v555_v12  ;;  %v1182_v16 = vpack.c.bf16 %v726_v9, %v725_v62 }
 0x11c   : > { %v559_v18 = vpop.f32.mrb[24].mxu0 }
 0x11d   : > { %v727_v20 = vadd.f32 %v1149_v7, %v679_v14  ;;  %v664_v21 = vadd.f32 %v1561_v26, %v641_v15  ;;  %v626_v22 = vsub.f32 %v1121_v13, %v559_v18  ;;  %v561_v23 = vpop.f32.mrb[25].mxu0  ;;  %1216 = vst [vmem:[%s1574_s19 + $0x20] sm:$0xff] %v1182_v16   ;;  %1286 = vmatpush3.bf16.msra.mxu1 %v1182_v16 }
 0x11e   : > { %1287 = vmatprep.subr.bf16.mxu1 %v1403_v19 }
 0x11f   : > { %v680_v28 = vmax.f32 %v664_v21, 0.0  ;;  %v642_v29 = vmul.f32 %v626_v22, %v561_v23 }
 0x120   : > { %v565_v31 = vpop.f32.mrb[26].mxu0 }
 0x121   : > { %v728_v32 = vadd.f32 %v1150_v17, %v680_v28  ;;  %v665_v33 = vadd.f32 %v1561_v26, %v642_v29  ;;  %v627_v34 = vsub.f32 %v1122_v25, %v565_v31  ;;  %v567_v35 = vpop.f32.mrb[27].mxu0 }
 0x123   : > { %v681_v37 = vmax.f32 %v665_v33, 0.0  ;;  %v643_v38 = vmul.f32 %v627_v34, %v567_v35  ;;  %v1187_v39 = vpack.c.bf16 %v728_v32, %v727_v20 }
 0x124   : > { %v571_v41 = vpop.f32.mrb[28].mxu0 }
 0x125   : > { %v729_v42 = vadd.f32 %v1153_v30, %v681_v37  ;;  %v666_v43 = vadd.f32 %v1561_v26, %v643_v38  ;;  %v628_v44 = vsub.f32 %v1125_v36, %v571_v41  ;;  %v573_v45 = vpop.f32.mrb[29].mxu0  ;;  %1217 = vst [vmem:[%s1574_s19 + $0x28] sm:$0xff] %v1187_v39   ;;  %1289 = vmatpush3.bf16.msra.mxu1 %v1187_v39 }
 0x126   : > { %1290 = vmatprep.subr.bf16.mxu1 %v1403_v19 }
 0x127   : > { %v682_v48 = vmax.f32 %v666_v43, 0.0  ;;  %v644_v49 = vmul.f32 %v628_v44, %v573_v45 }
 0x128   : > { %v577_v50 = vpop.f32.mrb[30].mxu0 }
 0x129   : > { %v730_v51 = vadd.f32 %v1154_v40, %v682_v48  ;;  %v667_v52 = vadd.f32 %v1561_v26, %v644_v49  ;;  %v629_v54 = vsub.f32 %v1126_v46, %v577_v50  ;;  %v579_v55 = vpop.f32.mrb[31].mxu0 }
 0x12b   : > { %v683_v56 = vmax.f32 %v667_v52, 0.0  ;;  %v645_v57 = vmul.f32 %v629_v54, %v579_v55  ;;  %v1192_v58 = vpack.c.bf16 %v730_v51, %v729_v42 }
 0x12d   : > { %v731_v59 = vadd.f32 %v1157_v53, %v683_v56  ;;  %v668_v60 = vadd.f32 %v1561_v26, %v645_v57  ;;  %1218 = vst [vmem:[%s1574_s19 + $0x30] sm:$0xff] %v1192_v58   ;;  %1292 = vmatpush3.bf16.msra.mxu1 %v1192_v58 }
 0x12e   : > { %1293 = vmatprep.subr.bf16.mxu1 %v1403_v19 }
 0x12f   : > { %v684_v62 = vmax.f32 %v668_v60, 0.0 }
 0x131   : > { %v732_v63 = vadd.f32 %v1158_v61, %v684_v62 }
 0x133   : > { %v1197_v0 = vpack.c.bf16 %v732_v63, %v731_v59 }
 0x135   : > { %1219 = vst [vmem:[%s1574_s19 + $0x38] sm:$0xff] %v1197_v0   ;;  %1295 = vmatpush3.bf16.msra.mxu1 %v1197_v0  ;;  %s891_s19 = scalar_lea.sflag [#allocation3], %s323_s8 }
 0x138   : > { %1270 = vmatmul.mubr.f32.vlgmr.msra.gmra.mrb[0].mxu1 %v813_v1 }
 0x20b   : > { %v880_v19 = vpop.f32.mrb[0].mxu1 }
 0x20c   : > { %884 = vst [vmem:[%s325_s13] sm:$0xff] %v880_v19  ;;  %v1271_v26 = vpop.f32.mrb[1].mxu1 }
 0x20d   : > { %1351 = shalt.err (!%p1348_p4)
}
 0x20e   : > { %s1352_s23 = scalar_lea.hbm %s1627_s18, 128  ;;  %s1356_s9 = scalar_lea.hbm %s1674_s7, 256 }
 0x20f   : > { %p1353_p7 = scmp.ne.s32.totalorder %s1627_s18, %s1352_s23  ;;  %p1357_p10 = scmp.lt.u32.totalorder %s1627_s18, %s1674_s7 }
 0x210   : > { %p1358_p11 = scmp.lt.u32.totalorder %s1356_s9, %s1352_s23  ;;  %p1360_p13 = scmp.lt.u32.totalorder %s1352_s23, %s1627_s18 }
 0x211   : > { %p1354_p8 = pnand %p1353_p7, %p1484_p5 }
 0x212   : > { %p1359_p12 = por %p1358_p11, %p1357_p10 }
 0x213   : > { %p1355_p9 = pneg %p1354_p8 }
 0x214   : > { %p1361_p0 = por %p1360_p13, %p1359_p12 }
 0x216   : > { %p1362_p1 = pnand %p1361_p0, %p1355_p9 }
 0x218   : > { %1365 = shalt.err (!%p1362_p1)
}
 0x219   : > { %1296 = dma.vmem_to_hbm [thread:$0]  (%p1484_p5), %s1622_s14, 128, %s1627_s18, %s891_s19  }
 0x21a PF: > { %p1302_p2 = scmp.ge.s32.totalorder %s1400_s27, 2  ;;  %s928_s16 = sand.u32 1, %s1388_s24  }
 0x21b   : > { %s929_s17 = scalar_lea.sflag [#allocation3], %s928_s16 }
 0x21c   : > { %p1299_p3 = pnand %p1302_p2, %p1488_p6 }
 0x21e   : > { %1383 = dma.done.wait (!%p1299_p3), %s929_s17, 128  }
 0x21f   : > { %1385 = vsyncadd (!%p1299_p3), %s929_s17, 4294967168  ;;  %p18_p4 = scmp.ge.s32.totalorder %s1471_s30, 4   ;;  %s1677_s24 = smov %s1392_s25 }
 0x220   : > { %s1678_s25 = smov %s1396_s26  ;;  %s1679_s26 = smov %s1482_s10 }
 0x221   : > { %s1680_s27 = smov %s1471_s30  ;;  %20 = sbr.rel (!%p18_p4) target bundleno = 3 (0x3), region = 100 }
 0x228   :  { %934 = vsyncpa [#allocation3], 1 }
 0x229   :  { %936 = vsyncpa [#allocation3 + $0x1], 1 }

// kernel: gcn_net_forward.4
= control target key start
LH: loop header
LB: loop body
LE: loop exit
PB: predicated region body
PF: predicated region fallthrough
CT: control target
= control target key end

     0   :  { %s1639_s21 = smov 0   ;;  %s1641_s22 = smov 0   ;;  %s1808_s0 = inlined_call_operand.vmem [shape: bf16[256,256], index: 0, kind: input, shape index: {}]   ;;  %s1809_s1 = inlined_call_operand.vmem [shape: bf16[256,128], index: 1, kind: input, shape index: {}]   ;;  %s1810_s2 = inlined_call_operand.vmem [shape: bf16[128,128], index: 2, kind: input, shape index: {}]   ;;  %s1811_s3 = inlined_call_operand.vmem [shape: f32[1,128], index: 3, kind: input, shape index: {}]   ;;  %s1812_s4 = inlined_call_operand.vmem [shape: f32[8,256], index: 4, kind: input, shape index: {}]   ;;  %s1813_s5 = inlined_call_operand.vmem [shape: bf16[256,128], index: 5, kind: output, shape index: {0}]   ;;  %s1814_s6 = inlined_call_operand.vmem [shape: f32[2,8,256], index: 6, kind: output, shape index: {1}]  }
   0x1   :  { %s1643_s23 = smov 0  }
   0x2 LB: > { %s29_s24 = sadd.s32 1, %s1597_s22  ;;  %p1229_p0 = scmp.ge.s32.totalorder %s1601_s23, 1  ;;  %s1601_s23 = sphi %s1643_s23, %s17_s23   ;;  %s1597_s22 = sphi %s1641_s22, %s1816_s22   ;;  %s1593_s21 = sphi %s1639_s21, %s1815_s21  }
   0x3   : > { %p31_p1 = scmp.ge.s32.totalorder %s29_s24, 2  ;;  %p256_p2 = scmp.lt.s32.totalorder %s1601_s23, 3 }
   0x5   : > { %s1818_s24 = smov (%p31_p1, %s29_s24), 0  ;;  %p257_p3 = pnand %p1229_p0, %p256_p2 }
   0x6   : > { %v1531_v0 = vld [vmem:[%s1809_s1 + $0x40] sm:$0xff] (!%p257_p3)   ;;  %s1230_s27 = sshll.u32 (!%p257_p3), %s1593_s21, 4  ;;  %v1533_v2 = vld [vmem:[%s1809_s1 + $0x48] sm:$0xff] (!%p257_p3)   ;;  %v1535_v4 = vld [vmem:[%s1809_s1 + $0x50] sm:$0xff] (!%p257_p3)   ;;  %p323_p5 = scmp.lt.s32.totalorder (!%p257_p3), %s1593_s21, 1 }
   0x7   : > { %260 = sbr.rel (%p257_p3) target bundleno = 757 (0x2f5), region = 40  ;;  %v1532_v1 = vld [vmem:[%s1809_s1] sm:$0xff] (!%p257_p3)   ;;  %1362 = vmatprep.subr.bf16.mxu0 (!%p257_p3), %v1531_v0  ;;  %v1534_v3 = vld [vmem:[%s1809_s1 + $0x8] sm:$0xff] (!%p257_p3)   ;;  %p307_p4 = scmp.lt.s32.totalorder (!%p257_p3), %s1230_s27, 31  ;;  %v1536_v5 = vld [vmem:[%s1809_s1 + $0x10] sm:$0xff] (!%p257_p3)  }
   0x8   : > { %1363 = vmatpush3.bf16.msra.mxu0 (!%p257_p3), %v1532_v1  ;;  %v1537_v6 = vld [vmem:[%s1809_s1 + $0x58] sm:$0xff] (!%p257_p3)   ;;  %v1539_v8 = vld [vmem:[%s1809_s1 + $0x60] sm:$0xff] (!%p257_p3)   ;;  %v1541_v10 = vld [vmem:[%s1809_s1 + $0x68] sm:$0xff] (!%p257_p3)  }
   0x9   : > { %1364 = vmatprep.subr.bf16.mxu0 (!%p257_p3), %v1533_v2  ;;  %v1538_v7 = vld [vmem:[%s1809_s1 + $0x18] sm:$0xff] (!%p257_p3)   ;;  %v1540_v9 = vld [vmem:[%s1809_s1 + $0x20] sm:$0xff] (!%p257_p3)   ;;  %v1542_v12 = vld [vmem:[%s1809_s1 + $0x28] sm:$0xff] (!%p257_p3)  }
   0xa   : > { %v1543_v13 = vld [vmem:[%s1809_s1 + $0x70] sm:$0xff] (!%p257_p3)   ;;  %v1545_v15 = vld [vmem:[%s1809_s1 + $0x78] sm:$0xff] (!%p257_p3)   ;;  %v1571_v17 = vld [vmem:[%s1810_s2] sm:$0xff] (!%p257_p3)  }
   0xb   : > { %v1544_v14 = vld [vmem:[%s1809_s1 + $0x30] sm:$0xff] (!%p257_p3)   ;;  %v1546_v16 = vld [vmem:[%s1809_s1 + $0x38] sm:$0xff] (!%p257_p3)   ;;  %v1572_v19 = vld [vmem:[%s1810_s2 + $0x8] sm:$0xff] (!%p257_p3)   ;;  %1442 = vmatprep.subr.bf16.mxu1 (!%p257_p3), %v1571_v17 }
   0xc   : > { %1365 = vmatpush3.bf16.msra.mxu0 (!%p257_p3), %v1534_v3  ;;  %1443 = vmatpush3.bf16.msra.mxu1 (!%p257_p3), %v1571_v17  ;;  %v1573_v21 = vld [vmem:[%s1810_s2 + $0x10] sm:$0xff] (!%p257_p3)   ;;  %v1574_v22 = vld [vmem:[%s1810_s2 + $0x18] sm:$0xff] (!%p257_p3)   ;;  %v1575_v36 = vld [vmem:[%s1810_s2 + $0x20] sm:$0xff] (!%p257_p3)  }
   0xd   : > { %1366 = vmatprep.subr.bf16.mxu0 (!%p257_p3), %v1535_v4  ;;  %1444 = vmatprep.subr.bf16.mxu1 (!%p257_p3), %v1572_v19  ;;  %v1576_v37 = vld [vmem:[%s1810_s2 + $0x28] sm:$0xff] (!%p257_p3)   ;;  %v1577_v38 = vld [vmem:[%s1810_s2 + $0x30] sm:$0xff] (!%p257_p3)   ;;  %v1578_v39 = vld [vmem:[%s1810_s2 + $0x38] sm:$0xff] (!%p257_p3)  }
   0xe   : > { %s1820_s27 = smov (!%p307_p4, %s1230_s27), 31  ;;  %s1822_s21 = smov (!%p323_p5, %s1593_s21), 1 }
   0xf   : > { %s1297_s18 = sshll.u32 %s1820_s27, 3  ;;  %s1298_s7 = sshll.u32 %s1822_s21, 4 }
  0x10   : > { %1367 = vmatpush3.bf16.msra.mxu0 %v1536_v5  ;;  %s1693_s28 = scalar_lea.vmem %s1808_s0, %s1297_s18  ;;  %1445 = vmatpush3.bf16.msra.mxu1 %v1572_v19  ;;  %s1235_s18 = sshll.u32 %s1820_s27, 2 }
  0x11   : > { %1368 = vmatprep.subr.bf16.mxu0 %v1537_v6  ;;  %v1549_v11 = vld [vmem:[%s1693_s28 + $0x4] ss:$8 sps:$4 sm:$0xff]   ;;  %v1547_v18 = vld [vmem:[%s1693_s28] ss:$8 sps:$4 sm:$0xff]   ;;  %v1550_v20 = vld [vmem:[%s1693_s28 + $0x14] ss:$8 sps:$4 sm:$0xff]   ;;  %1446 = vmatprep.subr.bf16.mxu1 %v1573_v21  ;;  %s1768_s25 = scalar_lea.vmem %s1813_s5, %s1235_s18  ;;  %s337_s10 = scalar_lea.vmem %s1814_s6, %s1298_s7 }
  0x12   : > { %631 = vmatprep.mubr.bf16.mxu0 %v1549_v11  ;;  %v1552_v23 = vld [vmem:[%s1693_s28 + $0x10] ss:$8 sps:$4 sm:$0xff]   ;;  %v1553_v24 = vld [vmem:[%s1693_s28 + $0x24] ss:$8 sps:$4 sm:$0xff]   ;;  %v1555_v25 = vld [vmem:[%s1693_s28 + $0x20] ss:$8 sps:$4 sm:$0xff]  }
  0x13   : > { %v1556_v26 = vld [vmem:[%s1693_s28 + $0x34] ss:$8 sps:$4 sm:$0xff]   ;;  %v1558_v27 = vld [vmem:[%s1693_s28 + $0x30] ss:$8 sps:$4 sm:$0xff]   ;;  %v1559_v28 = vld [vmem:[%s1693_s28 + $0x44] ss:$8 sps:$4 sm:$0xff]  }
  0x14   : > { %1369 = vmatpush3.bf16.msra.mxu0 %v1538_v7  ;;  %1447 = vmatpush3.bf16.msra.mxu1 %v1573_v21  ;;  %v1561_v29 = vld [vmem:[%s1693_s28 + $0x40] ss:$8 sps:$4 sm:$0xff]   ;;  %v1562_v30 = vld [vmem:[%s1693_s28 + $0x54] ss:$8 sps:$4 sm:$0xff]   ;;  %v1564_v31 = vld [vmem:[%s1693_s28 + $0x50] ss:$8 sps:$4 sm:$0xff]  }
  0x15   : > { %1370 = vmatprep.subr.bf16.mxu0 %v1539_v8  ;;  %1448 = vmatprep.subr.bf16.mxu1 %v1574_v22  ;;  %v1565_v32 = vld [vmem:[%s1693_s28 + $0x64] ss:$8 sps:$4 sm:$0xff]   ;;  %v1567_v33 = vld [vmem:[%s1693_s28 + $0x60] ss:$8 sps:$4 sm:$0xff]   ;;  %v1568_v34 = vld [vmem:[%s1693_s28 + $0x74] ss:$8 sps:$4 sm:$0xff]  }
  0x16   : > { %v1570_v35 = vld [vmem:[%s1693_s28 + $0x70] ss:$8 sps:$4 sm:$0xff]   ;;  %s1233_s27 = sshll.u32 %s1822_s21, 3 }
  0x17   : > { %s326_s30 = scalar_lea.vmem %s1812_s4, %s1233_s27 }
  0x18   : > { %1371 = vmatpush3.bf16.msra.mxu0 %v1540_v9  ;;  %1449 = vmatpush3.bf16.msra.mxu1 %v1574_v22 }
  0x19   : > { %1372 = vmatprep.subr.bf16.mxu0 %v1541_v10  ;;  %1450 = vmatprep.subr.bf16.mxu1 %v1575_v36 }
  0x1c   : > { %1373 = vmatpush3.bf16.msra.mxu0 %v1542_v12  ;;  %1451 = vmatpush3.bf16.msra.mxu1 %v1575_v36 }
  0x1d   : > { %1374 = vmatprep.subr.bf16.mxu0 %v1543_v13  ;;  %1452 = vmatprep.subr.bf16.mxu1 %v1576_v37 }
  0x20   : > { %1375 = vmatpush3.bf16.msra.mxu0 %v1544_v14  ;;  %1453 = vmatpush3.bf16.msra.mxu1 %v1576_v37 }
  0x21   : > { %1376 = vmatprep.subr.bf16.mxu0 %v1545_v15  ;;  %1454 = vmatprep.subr.bf16.mxu1 %v1577_v38 }
  0x24   : > { %1377 = vmatpush3.bf16.msra.mxu0 %v1546_v16  ;;  %1455 = vmatpush3.bf16.msra.mxu1 %v1577_v38 }
  0x25   : > { %1456 = vmatprep.subr.bf16.mxu1 %v1578_v39 }
  0x27   : > { %632 = vmatmul.mubr.bf16.vlgmr.msra.gmra.mrb[0].mxu0 %v1547_v18 }
  0x28   : > { %639 = vmatprep.mubr.bf16.mxu0 %v1550_v20  ;;  %1457 = vmatpush3.bf16.msra.mxu1 %v1578_v39 }
  0x2f   : > { %640 = vmatmul.mubr.bf16.gmra.mrb[4].mxu0 %v1552_v23 }
  0x30   : > { %647 = vmatprep.mubr.bf16.mxu0 %v1553_v24 }
  0x37   : > { %648 = vmatmul.mubr.bf16.gmra.mrb[8].mxu0 %v1555_v25 }
  0x38   : > { %655 = vmatprep.mubr.bf16.mxu0 %v1556_v26 }
  0x3f   : > { %656 = vmatmul.mubr.bf16.gmra.mrb[12].mxu0 %v1558_v27 }
  0x40   : > { %663 = vmatprep.mubr.bf16.mxu0 %v1559_v28 }
  0x47   : > { %664 = vmatmul.mubr.bf16.gmra.mrb[16].mxu0 %v1561_v29 }
  0x48   : > { %671 = vmatprep.mubr.bf16.mxu0 %v1562_v30 }
  0x4f   : > { %672 = vmatmul.mubr.bf16.gmra.mrb[20].mxu0 %v1564_v31 }
  0x50   : > { %679 = vmatprep.mubr.bf16.mxu0 %v1565_v32  ;;  %v1603_v32 = vmov 0.0  }
  0x57   : > { %680 = vmatmul.mubr.bf16.gmra.mrb[24].mxu0 %v1567_v33  ;;  %v1759_v33 = vld [vmem:[%s1811_s3] ss:$0 sm:$0xff] }
  0x58   : > { %687 = vmatprep.mubr.bf16.mxu0 %v1568_v34 }
  0x5f   : > { %688 = vmatmul.mubr.bf16.gmra.mrb[28].mxu0 %v1570_v35 }
  0xfa   : > { %v1378_v40 = vpop.f32.mrb[0].mxu0 }
  0xfb   : > { %v1379_v41 = vpop.f32.mrb[1].mxu0 }
  0xfc   : > { %v1380_v42 = vadd.f32 %v1379_v41, %v1378_v40  ;;  %v1381_v43 = vpop.f32.mrb[2].mxu0 }
  0xfd   : > { %v1382_v44 = vpop.f32.mrb[3].mxu0 }
  0xfe   : > { %v1383_v45 = vadd.f32 %v1382_v44, %v1381_v43 }
 0x100   : > { %v747_v46 = vpack.c.bf16 %v1383_v45, %v1380_v42 }
 0x102   : > { %v1384_v47 = vpop.f32.mrb[4].mxu0  ;;  %1458 = vmatprep.mubr.bf16.mxu1 %v747_v46 }
 0x103   : > { %v1385_v48 = vpop.f32.mrb[5].mxu0 }
 0x104   : > { %v1386_v49 = vadd.f32 %v1385_v48, %v1384_v47  ;;  %v1387_v50 = vpop.f32.mrb[6].mxu0 }
 0x105   : > { %v1388_v51 = vpop.f32.mrb[7].mxu0 }
 0x106   : > { %v1389_v52 = vadd.f32 %v1388_v51, %v1387_v50 }
 0x108   : > { %v748_v53 = vpack.c.bf16 %v1389_v52, %v1386_v49 }
 0x10a   : > { %v1390_v54 = vpop.f32.mrb[8].mxu0  ;;  %1459 = vmatmul.mubr.bf16.vlgmr.msra.gmra.mrb[0].mxu1 %v748_v53 }
 0x10b   : > { %v1391_v55 = vpop.f32.mrb[9].mxu0 }
 0x10c   : > { %v1392_v56 = vadd.f32 %v1391_v55, %v1390_v54  ;;  %v1393_v57 = vpop.f32.mrb[10].mxu0 }
 0x10d   : > { %v1394_v58 = vpop.f32.mrb[11].mxu0 }
 0x10e   : > { %v1395_v59 = vadd.f32 %v1394_v58, %v1393_v57 }
 0x110   : > { %v749_v60 = vpack.c.bf16 %v1395_v59, %v1392_v56 }
 0x112   : > { %v1396_v61 = vpop.f32.mrb[12].mxu0  ;;  %1462 = vmatprep.mubr.bf16.mxu1 %v749_v60 }
 0x113   : > { %v1397_v62 = vpop.f32.mrb[13].mxu0 }
 0x114   : > { %v1398_v63 = vadd.f32 %v1397_v62, %v1396_v61  ;;  %v1399_v0 = vpop.f32.mrb[14].mxu0 }
 0x115   : > { %v1400_v1 = vpop.f32.mrb[15].mxu0 }
 0x116   : > { %v1401_v2 = vadd.f32 %v1400_v1, %v1399_v0 }
 0x118   : > { %v750_v3 = vpack.c.bf16 %v1401_v2, %v1398_v63 }
 0x11a   : > { %v1402_v4 = vpop.f32.mrb[16].mxu0  ;;  %1463 = vmatmul.mubr.bf16.gmra.mrb[4].mxu1 %v750_v3 }
 0x11b   : > { %v1403_v5 = vpop.f32.mrb[17].mxu0 }
 0x11c   : > { %v1404_v6 = vadd.f32 %v1403_v5, %v1402_v4  ;;  %v1405_v7 = vpop.f32.mrb[18].mxu0 }
 0x11d   : > { %v1406_v8 = vpop.f32.mrb[19].mxu0 }
 0x11e   : > { %v1407_v9 = vadd.f32 %v1406_v8, %v1405_v7 }
 0x120   : > { %v751_v10 = vpack.c.bf16 %v1407_v9, %v1404_v6 }
 0x122   : > { %v1408_v11 = vpop.f32.mrb[20].mxu0  ;;  %1466 = vmatprep.mubr.bf16.mxu1 %v751_v10 }
 0x123   : > { %v1409_v12 = vpop.f32.mrb[21].mxu0 }
 0x124   : > { %v1410_v13 = vadd.f32 %v1409_v12, %v1408_v11  ;;  %v1411_v14 = vpop.f32.mrb[22].mxu0 }
 0x125   : > { %v1412_v15 = vpop.f32.mrb[23].mxu0 }
 0x126   : > { %v1413_v16 = vadd.f32 %v1412_v15, %v1411_v14 }
 0x128   : > { %v752_v17 = vpack.c.bf16 %v1413_v16, %v1410_v13 }
 0x12a   : > { %v1414_v18 = vpop.f32.mrb[24].mxu0  ;;  %1467 = vmatmul.mubr.bf16.gmra.mrb[8].mxu1 %v752_v17 }
 0x12b   : > { %v1415_v19 = vpop.f32.mrb[25].mxu0 }
 0x12c   : > { %v1416_v20 = vadd.f32 %v1415_v19, %v1414_v18  ;;  %v1417_v21 = vpop.f32.mrb[26].mxu0 }
 0x12d   : > { %v1418_v22 = vpop.f32.mrb[27].mxu0 }
 0x12e   : > { %v1419_v23 = vadd.f32 %v1418_v22, %v1417_v21 }
 0x130   : > { %v753_v24 = vpack.c.bf16 %v1419_v23, %v1416_v20 }
 0x132   : > { %v1420_v25 = vpop.f32.mrb[28].mxu0  ;;  %1470 = vmatprep.mubr.bf16.mxu1 %v753_v24 }
 0x133   : > { %v1421_v26 = vpop.f32.mrb[29].mxu0 }
 0x134   : > { %v1422_v27 = vadd.f32 %v1421_v26, %v1420_v25  ;;  %v1423_v28 = vpop.f32.mrb[30].mxu0 }
 0x135   : > { %v1424_v29 = vpop.f32.mrb[31].mxu0 }
 0x136   : > { %v1425_v30 = vadd.f32 %v1424_v29, %v1423_v28 }
 0x138   : > { %v754_v31 = vpack.c.bf16 %v1425_v30, %v1422_v27 }
 0x13a   : > { %1471 = vmatmul.mubr.bf16.gmra.mrb[12].mxu1 %v754_v31 }
 0x13b   : > { %1084 = vmatprep.mubr.f32.mxu1 %v1603_v32 }
 0x1dd   : > { %v1460_v34 = vpop.f32.mrb[0].mxu1 }
 0x1de   : > { %v869_v35 = vadd.f32 %v1460_v34, %v1759_v33  ;;  %v860_v36 = vpop.f32.mrb[1].mxu1 }
 0x1df   : > { %v861_v37 = vadd.f32 %v1759_v33, %v860_v36  ;;  %v1461_v38 = vpop.f32.mrb[2].mxu1 }
 0x1e0   : > { %v872_v39 = vadd.f32 %v1461_v38, %v1759_v33  ;;  %v863_v40 = vpop.f32.mrb[3].mxu1  ;;  %v1005_v42 = vmul.f32 %v869_v35, %v869_v35 }
 0x1e1   : > { %v864_v41 = vadd.f32 %v1759_v33, %v863_v40  ;;  %v1003_v45 = vmul.f32 %v861_v37, %v861_v37 }
 0x1e2   : > { %v1323_v43 = vpack.c.bf16 %v872_v39, %v869_v35  ;;  %v1006_v44 = vmul.f32 %v872_v39, %v872_v39 }
 0x1e3   : > { %v1318_v46 = vpack.c.bf16 %v864_v41, %v861_v37  ;;  %v1004_v47 = vmul.f32 %v864_v41, %v864_v41 }
 0x1e4   : > { %1355 = vst [vmem:[%s1768_s25 + $0x8] sm:$0xff] %v1323_v43   ;;  %v1478_v48 = vpack.c.bf16 %v1006_v44, %v1005_v42 }
 0x1e5   : > { %1319 = vst [vmem:[%s1768_s25] sm:$0xff] %v1318_v46   ;;  %v1474_v49 = vpack.c.bf16 %v1004_v47, %v1003_v45 }
 0x1e7   : > { %1475 = vmatprep.subr.bf16.mxu1 %v1474_v49 }
 0x1e8   : > { %1477 = vmatpush1.bf16.msra.mxu1 %v1318_v46 }
 0x1e9   : > { %1479 = vmatprep.subr.bf16.mxu1 %v1478_v48 }
 0x1ec   : > { %1481 = vmatpush1.bf16.msra.mxu1 %v1323_v43 }
 0x1ed   : > { %v1464_v50 = vpop.f32.mrb[4].mxu1 }
 0x1ee   : > { %v885_v51 = vadd.f32 %v1464_v50, %v1759_v33  ;;  %v876_v52 = vpop.f32.mrb[5].mxu1 }
 0x1ef   : > { %v877_v53 = vadd.f32 %v1759_v33, %v876_v52  ;;  %v1465_v54 = vpop.f32.mrb[6].mxu1 }
 0x1f0   : > { %v888_v55 = vadd.f32 %v1465_v54, %v1759_v33  ;;  %v879_v56 = vpop.f32.mrb[7].mxu1  ;;  %v1009_v58 = vmul.f32 %v885_v51, %v885_v51 }
 0x1f1   : > { %v880_v57 = vadd.f32 %v1759_v33, %v879_v56  ;;  %v1007_v61 = vmul.f32 %v877_v53, %v877_v53 }
 0x1f2   : > { %v1333_v59 = vpack.c.bf16 %v888_v55, %v885_v51  ;;  %v1010_v60 = vmul.f32 %v888_v55, %v888_v55 }
 0x1f3   : > { %v1328_v62 = vpack.c.bf16 %v880_v57, %v877_v53  ;;  %v1008_v63 = vmul.f32 %v880_v57, %v880_v57 }
 0x1f4   : > { %1357 = vst [vmem:[%s1768_s25 + $0x18] sm:$0xff] %v1333_v59   ;;  %v1486_v0 = vpack.c.bf16 %v1010_v60, %v1009_v58 }
 0x1f5   : > { %1356 = vst [vmem:[%s1768_s25 + $0x10] sm:$0xff] %v1328_v62   ;;  %v1482_v1 = vpack.c.bf16 %v1008_v63, %v1007_v61 }
 0x1f7   : > { %1483 = vmatprep.subr.bf16.mxu1 %v1482_v1 }
 0x1f8   : > { %1485 = vmatpush1.bf16.msra.mxu1 %v1328_v62 }
 0x1f9   : > { %1487 = vmatprep.subr.bf16.mxu1 %v1486_v0 }
 0x1fc   : > { %1489 = vmatpush1.bf16.msra.mxu1 %v1333_v59 }
 0x1fd   : > { %v1468_v2 = vpop.f32.mrb[8].mxu1 }
 0x1fe   : > { %v901_v3 = vadd.f32 %v1468_v2, %v1759_v33  ;;  %v892_v4 = vpop.f32.mrb[9].mxu1 }
 0x1ff   : > { %v893_v5 = vadd.f32 %v1759_v33, %v892_v4  ;;  %v1469_v6 = vpop.f32.mrb[10].mxu1 }
 0x200   : > { %v904_v7 = vadd.f32 %v1469_v6, %v1759_v33  ;;  %v895_v8 = vpop.f32.mrb[11].mxu1  ;;  %v1013_v10 = vmul.f32 %v901_v3, %v901_v3 }
 0x201   : > { %v896_v9 = vadd.f32 %v1759_v33, %v895_v8  ;;  %v1011_v13 = vmul.f32 %v893_v5, %v893_v5 }
 0x202   : > { %v1343_v11 = vpack.c.bf16 %v904_v7, %v901_v3  ;;  %v1014_v12 = vmul.f32 %v904_v7, %v904_v7 }
 0x203   : > { %v1338_v14 = vpack.c.bf16 %v896_v9, %v893_v5  ;;  %v1012_v15 = vmul.f32 %v896_v9, %v896_v9 }
 0x204   : > { %1359 = vst [vmem:[%s1768_s25 + $0x28] sm:$0xff] %v1343_v11   ;;  %v1494_v16 = vpack.c.bf16 %v1014_v12, %v1013_v10 }
 0x205   : > { %1358 = vst [vmem:[%s1768_s25 + $0x20] sm:$0xff] %v1338_v14   ;;  %v1490_v17 = vpack.c.bf16 %v1012_v15, %v1011_v13 }
 0x207   : > { %1491 = vmatprep.subr.bf16.mxu1 %v1490_v17 }
 0x208   : > { %1493 = vmatpush1.bf16.msra.mxu1 %v1338_v14 }
 0x209   : > { %1495 = vmatprep.subr.bf16.mxu1 %v1494_v16 }
 0x20c   : > { %1497 = vmatpush1.bf16.msra.mxu1 %v1343_v11 }
 0x20d   : > { %v1472_v18 = vpop.f32.mrb[12].mxu1 }
 0x20e   : > { %v917_v19 = vadd.f32 %v1472_v18, %v1759_v33  ;;  %v908_v20 = vpop.f32.mrb[13].mxu1 }
 0x20f   : > { %v909_v21 = vadd.f32 %v1759_v33, %v908_v20  ;;  %v1473_v22 = vpop.f32.mrb[14].mxu1 }
 0x210   : > { %v920_v23 = vadd.f32 %v1473_v22, %v1759_v33  ;;  %v911_v24 = vpop.f32.mrb[15].mxu1  ;;  %v1017_v26 = vmul.f32 %v917_v19, %v917_v19 }
 0x211   : > { %v912_v25 = vadd.f32 %v1759_v33, %v911_v24  ;;  %v1015_v29 = vmul.f32 %v909_v21, %v909_v21  ;;  %v1019_v33 = vld [vmem:[%s326_s30] sm:$0xff] }
 0x212   : > { %v1353_v27 = vpack.c.bf16 %v920_v23, %v917_v19  ;;  %v1018_v28 = vmul.f32 %v920_v23, %v920_v23 }
 0x213   : > { %v1348_v30 = vpack.c.bf16 %v912_v25, %v909_v21  ;;  %v1016_v31 = vmul.f32 %v912_v25, %v912_v25 }
 0x214   : > { %1361 = vst [vmem:[%s1768_s25 + $0x38] sm:$0xff] %v1353_v27   ;;  %v1502_v32 = vpack.c.bf16 %v1018_v28, %v1017_v26 }
 0x215   : > { %1360 = vst [vmem:[%s1768_s25 + $0x30] sm:$0xff] %v1348_v30   ;;  %v1498_v34 = vpack.c.bf16 %v1016_v31, %v1015_v29 }
 0x217   : > { %1499 = vmatprep.subr.bf16.mxu1 %v1498_v34 }
 0x218   : > { %1501 = vmatpush1.bf16.msra.mxu1 %v1348_v30 }
 0x219   : > { %1503 = vmatprep.subr.bf16.mxu1 %v1502_v32 }
 0x21c   : > { %1505 = vmatpush1.bf16.msra.mxu1 %v1353_v27 }
 0x21f   : > { %1085 = vmatmul.mubr.f32.vlgmr.msra.gmra.mrb[16].mxu1 %v1019_v33 }
 0x2f2   : > { %v1086_v35 = vpop.f32.mrb[16].mxu1 }
 0x2f3   : > { %1091 = vst [vmem:[%s337_s10] sm:$0xff] %v1086_v35  ;;  %v1088_v36 = vpop.f32.mrb[17].mxu1 }
 0x2f4   : > { %1092 = vst [vmem:[%s337_s10 + $0x8] sm:$0xff] %v1088_v36 }
 0x2f5 PF: > { %s17_s23 = sadd.s32 1, %s1601_s23   ;;  %s1815_s21 = smov %s1597_s22 }
 0x2f6   : > { %p14_p6 = scmp.ge.s32.totalorder %s17_s23, 4   ;;  %s1816_s22 = smov %s1818_s24 }
 0x2f8   :  { %16 = sbr.rel (!%p14_p6) target bundleno = 2 (0x2), region = 96 }

// kernel: gcn_net_forward.7
= control target key start
LH: loop header
LB: loop body
LE: loop exit
PB: predicated region body
PF: predicated region fallthrough
CT: control target
= control target key end

     0   :  { %s1337_s24 = smov 0   ;;  %s1479_s0 = inlined_call_operand.vmem [shape: bf16[256,128], index: 0, kind: input, shape index: {}]   ;;  %s1480_s1 = inlined_call_operand.vmem [shape: bf16[256,128], index: 1, kind: input, shape index: {}]   ;;  %s1481_s2 = inlined_call_operand.vmem [shape: f32[256,8], index: 2, kind: input, shape index: {}]   ;;  %s1482_s3 = inlined_call_operand.vmem [shape: f32[8,256], index: 3, kind: input, shape index: {}]   ;;  %s1483_s4 = inlined_call_operand.vmem [shape: f32[1,128], index: 4, kind: input, shape index: {}]   ;;  %s1484_s5 = inlined_call_operand.vmem [shape: f32[8,256], index: 5, kind: input, shape index: {}]   ;;  %s1485_s6 = inlined_call_operand.vmem [shape: bf16[256,128], index: 6, kind: output, shape index: {0}]   ;;  %s1486_s7 = inlined_call_operand.vmem [shape: f32[2,8,128], index: 7, kind: output, shape index: {1}]  }
   0x1 LB: > { %s1343_s25 = sadd.s32 4294967295, %s1292_s24   ;;  %p1012_p0 = scmp.ge.s32.totalorder %s1292_s24, 1  ;;  %s1292_s24 = sphi %s1337_s24, %s18_s24  }
   0x2   : > { %p272_p1 = scmp.lt.s32.totalorder %s1292_s24, 3 }
   0x4   : > { %p273_p2 = pnand %p1012_p0, %p272_p1 }
   0x5   : > { %v371_v0 = vld [vmem:[%s1482_s3 + $0x8] sm:$0xff] (!%p273_p2)  ;;  %v370_v1 = vld [vmem:[%s1482_s3] sm:$0xff] (!%p273_p2)  ;;  %s1013_s30 = sshll.u32 (!%p273_p2), %s1343_s25, 4  ;;  %v1294_v2 = vmov (!%p273_p2), 0.0   ;;  %vm372_vm0 = vcmask (!%p273_p2), 64512   ;;  %v1295_v19 = vmov (!%p273_p2), 0.0|0.0  }
   0x6   : > { %276 = sbr.rel (%p273_p2) target bundleno = 517 (0x205), region = 44  ;;  %421 = vmatprep.subr.mxu0 (!%p273_p2), %v371_v0  ;;  %485 = vmatprep.mubr.f32.mxu0 (!%p273_p2), %v1294_v2  ;;  %p323_p3 = scmp.lt.s32.totalorder (!%p273_p2), %s1013_s30, 31  ;;  %vm1296_vm1 = vmmov (!%p273_p2), 0   ;;  %v1414_v26 = vld [vmem:[%s1483_s4] ss:$0 sm:$0xff] (!%p273_p2) }
   0x7   : > { %422 = vmatpush1.msra.mxu0 (!%p273_p2), %v370_v1  ;;  %1251 = vmatprep.subr.bf16.mxu1 (!%p273_p2), %v1295_v19  ;;  %p340_p4 = scmp.lt.s32.totalorder (!%p273_p2), %s1343_s25, 1 }
   0x8   : > { %1248 = vmatprep.mubr.msk.f32.mxu1 (!%p273_p2), %vm1296_vm1, %v1294_v2 }
   0xd   : > { %s1488_s30 = smov (!%p323_p3, %s1013_s30), 31  ;;  %s1490_s25 = smov (!%p340_p4, %s1343_s25), 1 }
   0xe   : > { %s1018_s8 = sshll.u32 %s1488_s30, 3  ;;  %s1396_s12 = sshll.u32 %s1488_s30, 2 }
   0xf   : > { %s1360_s11 = scalar_lea.vmem %s1481_s2, %s1018_s8  ;;  %s1402_s15 = scalar_lea.vmem %s1479_s0, %s1396_s12 }
  0x10   : > { %v354_v3 = vld [vmem:[%s1360_s11] sm:$0xff]  ;;  %v355_v4 = vld [vmem:[%s1360_s11 + $0x8] sm:$0xff]  ;;  %v356_v5 = vld [vmem:[%s1360_s11 + $0x10] sm:$0xff]  ;;  %s1409_s18 = scalar_lea.vmem %s1480_s1, %s1396_s12  ;;  %s1427_s23 = scalar_lea.vmem %s1485_s6, %s1396_s12 }
  0x11   : > { %1023 = vmatmul.mubr.msk.f32.vlgmr.msra.gmra.mrb[0].mxu0 %vm372_vm0, %v354_v3  ;;  %v357_v6 = vld [vmem:[%s1360_s11 + $0x18] sm:$0xff]  ;;  %v358_v7 = vld [vmem:[%s1360_s11 + $0x20] sm:$0xff]  ;;  %v359_v8 = vld [vmem:[%s1360_s11 + $0x28] sm:$0xff]  ;;  %s1019_s26 = sshll.u32 %s1490_s25, 3 }
  0x12   : > { %491 = vmatprep.mubr.f32.mxu0 %v1294_v2  ;;  %v360_v9 = vld [vmem:[%s1360_s11 + $0x30] sm:$0xff]  ;;  %v361_v10 = vld [vmem:[%s1360_s11 + $0x38] sm:$0xff]  ;;  %v362_v11 = vld [vmem:[%s1360_s11 + $0x40] sm:$0xff]  ;;  %s343_s29 = scalar_lea.vmem %s1484_s5, %s1019_s26  ;;  %s353_s9 = scalar_lea.vmem %s1486_s7, %s1019_s26 }
  0x13   : > { %v363_v12 = vld [vmem:[%s1360_s11 + $0x48] sm:$0xff]  ;;  %v364_v13 = vld [vmem:[%s1360_s11 + $0x50] sm:$0xff]  ;;  %v365_v14 = vld [vmem:[%s1360_s11 + $0x58] sm:$0xff] }
  0x14   : > { %v366_v15 = vld [vmem:[%s1360_s11 + $0x60] sm:$0xff]  ;;  %v367_v16 = vld [vmem:[%s1360_s11 + $0x68] sm:$0xff]  ;;  %v368_v17 = vld [vmem:[%s1360_s11 + $0x70] sm:$0xff] }
  0x15   : > { %1024 = vmatmul.mubr.msk.f32.gmra.mrb[2].mxu0 %vm372_vm0, %v355_v4  ;;  %v369_v18 = vld [vmem:[%s1360_s11 + $0x78] sm:$0xff]  ;;  %v1075_v20 = vld [vmem:[%s1402_s15] sm:$0xff]   ;;  %v1178_v27 = vld [vmem:[%s1402_s15 + $0x8] sm:$0xff]  }
  0x16   : > { %497 = vmatprep.mubr.f32.mxu0 %v1294_v2  ;;  %v1076_v21 = vunpack.c.l.bf16 %v1075_v20  ;;  %v1077_v25 = vunpack.c.h.bf16 %v1075_v20  ;;  %v1107_v28 = vld [vmem:[%s1409_s18] sm:$0xff]   ;;  %v1080_v34 = vunpack.c.l.bf16 %v1178_v27  ;;  %v1081_v39 = vunpack.c.h.bf16 %v1178_v27  ;;  %v1185_v43 = vld [vmem:[%s1409_s18 + $0x8] sm:$0xff]   ;;  %v1179_v46 = vld [vmem:[%s1402_s15 + $0x10] sm:$0xff]  }
  0x17   : > { %v1108_v35 = vunpack.c.l.bf16 %v1107_v28  ;;  %v1109_v44 = vunpack.c.h.bf16 %v1107_v28  ;;  %v1112_v49 = vunpack.c.l.bf16 %v1185_v43  ;;  %v1084_v54 = vunpack.c.l.bf16 %v1179_v46  ;;  %v1186_v1 = vld [vmem:[%s1409_s18 + $0x10] sm:$0xff]   ;;  %v1180_v3 = vld [vmem:[%s1402_s15 + $0x18] sm:$0xff]  }
  0x18   : > { %v1113_v59 = vunpack.c.h.bf16 %v1185_v43 }
  0x19   : > { %1025 = vmatmul.mubr.msk.f32.gmra.mrb[4].mxu0 %vm372_vm0, %v356_v5 }
  0x1a   : > { %503 = vmatprep.mubr.f32.mxu0 %v1294_v2 }
  0x1d   : > { %1026 = vmatmul.mubr.msk.f32.gmra.mrb[6].mxu0 %vm372_vm0, %v357_v6  ;;  %v1116_v6 = vunpack.c.l.bf16 %v1186_v1 }
  0x1e   : > { %509 = vmatprep.mubr.f32.mxu0 %v1294_v2 }
  0x21   : > { %1027 = vmatmul.mubr.msk.f32.gmra.mrb[8].mxu0 %vm372_vm0, %v358_v7 }
  0x22   : > { %515 = vmatprep.mubr.f32.mxu0 %v1294_v2 }
  0x25   : > { %1028 = vmatmul.mubr.msk.f32.gmra.mrb[10].mxu0 %vm372_vm0, %v359_v8 }
  0x26   : > { %521 = vmatprep.mubr.f32.mxu0 %v1294_v2 }
  0x29   : > { %1029 = vmatmul.mubr.msk.f32.gmra.mrb[12].mxu0 %vm372_vm0, %v360_v9 }
  0x2a   : > { %527 = vmatprep.mubr.f32.mxu0 %v1294_v2 }
  0x2d   : > { %1030 = vmatmul.mubr.msk.f32.gmra.mrb[14].mxu0 %vm372_vm0, %v361_v10 }
  0x2e   : > { %533 = vmatprep.mubr.f32.mxu0 %v1294_v2 }
  0x31   : > { %1031 = vmatmul.mubr.msk.f32.gmra.mrb[16].mxu0 %vm372_vm0, %v362_v11 }
  0x32   : > { %539 = vmatprep.mubr.f32.mxu0 %v1294_v2 }
  0x35   : > { %1032 = vmatmul.mubr.msk.f32.gmra.mrb[18].mxu0 %vm372_vm0, %v363_v12  ;;  %v1088_v12 = vunpack.c.l.bf16 %v1180_v3 }
  0x36   : > { %545 = vmatprep.mubr.f32.mxu0 %v1294_v2 }
  0x39   : > { %1033 = vmatmul.mubr.msk.f32.gmra.mrb[20].mxu0 %vm372_vm0, %v364_v13 }
  0x3a   : > { %551 = vmatprep.mubr.f32.mxu0 %v1294_v2 }
  0x3d   : > { %1034 = vmatmul.mubr.msk.f32.gmra.mrb[22].mxu0 %vm372_vm0, %v365_v14 }
  0x3e   : > { %557 = vmatprep.mubr.f32.mxu0 %v1294_v2 }
  0x41   : > { %1035 = vmatmul.mubr.msk.f32.gmra.mrb[24].mxu0 %vm372_vm0, %v366_v15 }
  0x42   : > { %563 = vmatprep.mubr.f32.mxu0 %v1294_v2 }
  0x45   : > { %1036 = vmatmul.mubr.msk.f32.gmra.mrb[26].mxu0 %vm372_vm0, %v367_v16  ;;  %v1117_v16 = vunpack.c.h.bf16 %v1186_v1 }
  0x46   : > { %569 = vmatprep.mubr.f32.mxu0 %v1294_v2 }
  0x49   : > { %1037 = vmatmul.mubr.msk.f32.gmra.mrb[28].mxu0 %vm372_vm0, %v368_v17 }
  0x4a   : > { %575 = vmatprep.mubr.f32.mxu0 %v1294_v2  ;;  %v1085_v2 = vunpack.c.h.bf16 %v1179_v46 }
  0x4d   : > { %1038 = vmatmul.mubr.msk.f32.gmra.mrb[30].mxu0 %vm372_vm0, %v369_v18 }
  0xe4   : > { %v487_v22 = vpop.f32.mrb[0].mxu0 }
  0xe5   : > { %v614_v23 = vsub.f32 %v1076_v21, %v487_v22  ;;  %v489_v24 = vpop.f32.mrb[1].mxu0 }
  0xe7   : > { %v630_v29 = vmul.f32 %v614_v23, %v489_v24  ;;  %v1187_v23 = vld [vmem:[%s1409_s18 + $0x18] sm:$0xff]   ;;  %v1089_v24 = vunpack.c.h.bf16 %v1180_v3 }
  0xe8   : > { %v493_v30 = vpop.f32.mrb[2].mxu0 }
  0xe9   : > { %v653_v31 = vadd.f32 %v1414_v26, %v630_v29  ;;  %v615_v32 = vsub.f32 %v1077_v25, %v493_v30  ;;  %v495_v33 = vpop.f32.mrb[3].mxu0  ;;  %v1181_v25 = vld [vmem:[%s1402_s15 + $0x20] sm:$0xff]   ;;  %v1120_v29 = vunpack.c.l.bf16 %v1187_v23 }
  0xea   : > { %v1093_v46 = vunpack.c.h.bf16 %v1181_v25 }
  0xeb   : > { %v669_v36 = vmax.f32 %v653_v31, 0.0  ;;  %v631_v37 = vmul.f32 %v615_v32, %v495_v33 }
  0xec   : > { %v499_v38 = vpop.f32.mrb[4].mxu0 }
  0xed   : > { %v654_v40 = vadd.f32 %v1414_v26, %v631_v37  ;;  %v616_v41 = vsub.f32 %v1080_v34, %v499_v38  ;;  %v501_v42 = vpop.f32.mrb[5].mxu0  ;;  %v717_v45 = vadd.f32 %v1108_v35, %v669_v36  ;;  %v1092_v35 = vunpack.c.l.bf16 %v1181_v25 }
  0xef   : > { %v670_v47 = vmax.f32 %v654_v40, 0.0  ;;  %v632_v48 = vmul.f32 %v616_v41, %v501_v42 }
  0xf0   : > { %v505_v50 = vpop.f32.mrb[6].mxu0 }
  0xf1   : > { %v655_v51 = vadd.f32 %v1414_v26, %v632_v48  ;;  %v617_v52 = vsub.f32 %v1081_v39, %v505_v50  ;;  %v507_v53 = vpop.f32.mrb[7].mxu0  ;;  %v718_v55 = vadd.f32 %v1109_v44, %v670_v47  ;;  %v1121_v39 = vunpack.c.h.bf16 %v1187_v23  ;;  %v1182_v47 = vld [vmem:[%s1402_s15 + $0x28] sm:$0xff]  }
  0xf2   : > { %v1097_v3 = vunpack.c.h.bf16 %v1182_v47 }
  0xf3   : > { %v671_v56 = vmax.f32 %v655_v51, 0.0  ;;  %v633_v57 = vmul.f32 %v617_v52, %v507_v53  ;;  %v1141_v58 = vpack.c.bf16 %v718_v55, %v717_v45  ;;  %v1188_v45 = vld [vmem:[%s1409_s18 + $0x20] sm:$0xff]  }
  0xf4   : > { %v511_v60 = vpop.f32.mrb[8].mxu0  ;;  %v1124_v50 = vunpack.c.l.bf16 %v1188_v45 }
  0xf5   : > { %v719_v61 = vadd.f32 %v1112_v49, %v671_v56  ;;  %v656_v62 = vadd.f32 %v1414_v26, %v633_v57  ;;  %v618_v63 = vsub.f32 %v1084_v54, %v511_v60  ;;  %v513_v0 = vpop.f32.mrb[9].mxu0  ;;  %1142 = vst [vmem:[%s1427_s23] sm:$0xff] %v1141_v58   ;;  %1253 = vmatpush3.bf16.msra.mxu1 %v1141_v58  ;;  %v1096_v56 = vunpack.c.l.bf16 %v1182_v47  ;;  %v1191_v47 = vld [vmem:[%s1409_s18 + $0x38] sm:$0xff]  }
  0xf6   : > { %1254 = vmatprep.subr.bf16.mxu1 %v1295_v19  ;;  %v1125_v60 = vunpack.c.h.bf16 %v1188_v45 }
  0xf7   : > { %v672_v4 = vmax.f32 %v656_v62, 0.0  ;;  %v634_v5 = vmul.f32 %v618_v63, %v513_v0 }
  0xf8   : > { %v517_v7 = vpop.f32.mrb[10].mxu0 }
  0xf9   : > { %v720_v8 = vadd.f32 %v1113_v59, %v672_v4  ;;  %v657_v9 = vadd.f32 %v1414_v26, %v634_v5  ;;  %v619_v10 = vsub.f32 %v1085_v2, %v517_v7  ;;  %v519_v11 = vpop.f32.mrb[11].mxu0  ;;  %v1189_v2 = vld [vmem:[%s1409_s18 + $0x28] sm:$0xff]   ;;  %v1183_v4 = vld [vmem:[%s1402_s15 + $0x30] sm:$0xff]  }
  0xfa   : > { %v1128_v7 = vunpack.c.l.bf16 %v1189_v2  ;;  %v1101_v25 = vunpack.c.h.bf16 %v1183_v4 }
  0xfb   : > { %v673_v13 = vmax.f32 %v657_v9, 0.0  ;;  %v635_v14 = vmul.f32 %v619_v10, %v519_v11  ;;  %v1146_v15 = vpack.c.bf16 %v720_v8, %v719_v61 }
  0xfc   : > { %v523_v17 = vpop.f32.mrb[12].mxu0 }
  0xfd   : > { %v721_v18 = vadd.f32 %v1116_v6, %v673_v13  ;;  %v658_v20 = vadd.f32 %v1414_v26, %v635_v14  ;;  %v620_v21 = vsub.f32 %v1088_v12, %v523_v17  ;;  %v525_v22 = vpop.f32.mrb[13].mxu0  ;;  %1192 = vst [vmem:[%s1427_s23 + $0x8] sm:$0xff] %v1146_v15   ;;  %1256 = vmatpush3.bf16.msra.mxu1 %v1146_v15  ;;  %v1100_v13 = vunpack.c.l.bf16 %v1183_v4 }
  0xfe   : > { %1257 = vmatprep.subr.bf16.mxu1 %v1295_v19  ;;  %v1129_v17 = vunpack.c.h.bf16 %v1189_v2 }
  0xff   : > { %v674_v27 = vmax.f32 %v658_v20, 0.0  ;;  %v636_v28 = vmul.f32 %v620_v21, %v525_v22 }
 0x100   : > { %v529_v30 = vpop.f32.mrb[14].mxu0 }
 0x101   : > { %v722_v31 = vadd.f32 %v1117_v16, %v674_v27  ;;  %v659_v32 = vadd.f32 %v1414_v26, %v636_v28  ;;  %v621_v33 = vsub.f32 %v1089_v24, %v529_v30  ;;  %v531_v34 = vpop.f32.mrb[15].mxu0  ;;  %v1190_v24 = vld [vmem:[%s1409_s18 + $0x30] sm:$0xff]   ;;  %v1184_v27 = vld [vmem:[%s1402_s15 + $0x38] sm:$0xff]  }
 0x102   : > { %v1132_v30 = vunpack.c.l.bf16 %v1190_v24 }
 0x103   : > { %v675_v36 = vmax.f32 %v659_v32, 0.0  ;;  %v637_v37 = vmul.f32 %v621_v33, %v531_v34  ;;  %v1151_v38 = vpack.c.bf16 %v722_v31, %v721_v18 }
 0x104   : > { %v535_v40 = vpop.f32.mrb[16].mxu0 }
 0x105   : > { %v723_v41 = vadd.f32 %v1120_v29, %v675_v36  ;;  %v660_v42 = vadd.f32 %v1414_v26, %v637_v37  ;;  %v622_v43 = vsub.f32 %v1092_v35, %v535_v40  ;;  %v537_v44 = vpop.f32.mrb[17].mxu0  ;;  %1193 = vst [vmem:[%s1427_s23 + $0x10] sm:$0xff] %v1151_v38   ;;  %1259 = vmatpush3.bf16.msra.mxu1 %v1151_v38  ;;  %v1104_v36 = vunpack.c.l.bf16 %v1184_v27 }
 0x106   : > { %1260 = vmatprep.subr.bf16.mxu1 %v1295_v19  ;;  %v1133_v40 = vunpack.c.h.bf16 %v1190_v24 }
 0x107   : > { %v676_v48 = vmax.f32 %v660_v42, 0.0  ;;  %v638_v49 = vmul.f32 %v622_v43, %v537_v44 }
 0x108   : > { %v541_v51 = vpop.f32.mrb[18].mxu0 }
 0x109   : > { %v724_v52 = vadd.f32 %v1121_v39, %v676_v48  ;;  %v661_v53 = vadd.f32 %v1414_v26, %v638_v49  ;;  %v623_v54 = vsub.f32 %v1093_v46, %v541_v51  ;;  %v543_v55 = vpop.f32.mrb[19].mxu0  ;;  %v1105_v46 = vunpack.c.h.bf16 %v1184_v27 }
 0x10b   : > { %v677_v57 = vmax.f32 %v661_v53, 0.0  ;;  %v639_v58 = vmul.f32 %v623_v54, %v543_v55  ;;  %v1156_v59 = vpack.c.bf16 %v724_v52, %v723_v41  ;;  %v1136_v53 = vunpack.c.l.bf16 %v1191_v47 }
 0x10c   : > { %v547_v61 = vpop.f32.mrb[20].mxu0 }
 0x10d   : > { %v725_v62 = vadd.f32 %v1124_v50, %v677_v57  ;;  %v662_v63 = vadd.f32 %v1414_v26, %v639_v58  ;;  %v624_v0 = vsub.f32 %v1096_v56, %v547_v61  ;;  %v549_v1 = vpop.f32.mrb[21].mxu0  ;;  %1194 = vst [vmem:[%s1427_s23 + $0x18] sm:$0xff] %v1156_v59   ;;  %1262 = vmatpush3.bf16.msra.mxu1 %v1156_v59  ;;  %v1137_v61 = vunpack.c.h.bf16 %v1191_v47 }
 0x10e   : > { %1263 = vmatprep.subr.bf16.mxu1 %v1295_v19 }
 0x10f   : > { %v678_v5 = vmax.f32 %v662_v63, 0.0  ;;  %v640_v6 = vmul.f32 %v624_v0, %v549_v1  ;;  %v813_v1 = vld [vmem:[%s343_s29] sm:$0xff] }
 0x110   : > { %v553_v8 = vpop.f32.mrb[22].mxu0 }
 0x111   : > { %v726_v9 = vadd.f32 %v1125_v60, %v678_v5  ;;  %v663_v10 = vadd.f32 %v1414_v26, %v640_v6  ;;  %v625_v11 = vsub.f32 %v1097_v3, %v553_v8  ;;  %v555_v12 = vpop.f32.mrb[23].mxu0 }
 0x113   : > { %v679_v14 = vmax.f32 %v663_v10, 0.0  ;;  %v641_v15 = vmul.f32 %v625_v11, %v555_v12  ;;  %v1161_v16 = vpack.c.bf16 %v726_v9, %v725_v62 }
 0x114   : > { %v559_v18 = vpop.f32.mrb[24].mxu0 }
 0x115   : > { %v727_v20 = vadd.f32 %v1128_v7, %v679_v14  ;;  %v664_v21 = vadd.f32 %v1414_v26, %v641_v15  ;;  %v626_v22 = vsub.f32 %v1100_v13, %v559_v18  ;;  %v561_v23 = vpop.f32.mrb[25].mxu0  ;;  %1195 = vst [vmem:[%s1427_s23 + $0x20] sm:$0xff] %v1161_v16   ;;  %1265 = vmatpush3.bf16.msra.mxu1 %v1161_v16 }
 0x116   : > { %1266 = vmatprep.subr.bf16.mxu1 %v1295_v19 }
 0x117   : > { %v680_v28 = vmax.f32 %v664_v21, 0.0  ;;  %v642_v29 = vmul.f32 %v626_v22, %v561_v23 }
 0x118   : > { %v565_v31 = vpop.f32.mrb[26].mxu0 }
 0x119   : > { %v728_v32 = vadd.f32 %v1129_v17, %v680_v28  ;;  %v665_v33 = vadd.f32 %v1414_v26, %v642_v29  ;;  %v627_v34 = vsub.f32 %v1101_v25, %v565_v31  ;;  %v567_v35 = vpop.f32.mrb[27].mxu0 }
 0x11b   : > { %v681_v37 = vmax.f32 %v665_v33, 0.0  ;;  %v643_v38 = vmul.f32 %v627_v34, %v567_v35  ;;  %v1166_v39 = vpack.c.bf16 %v728_v32, %v727_v20 }
 0x11c   : > { %v571_v41 = vpop.f32.mrb[28].mxu0 }
 0x11d   : > { %v729_v42 = vadd.f32 %v1132_v30, %v681_v37  ;;  %v666_v43 = vadd.f32 %v1414_v26, %v643_v38  ;;  %v628_v44 = vsub.f32 %v1104_v36, %v571_v41  ;;  %v573_v45 = vpop.f32.mrb[29].mxu0  ;;  %1196 = vst [vmem:[%s1427_s23 + $0x28] sm:$0xff] %v1166_v39   ;;  %1268 = vmatpush3.bf16.msra.mxu1 %v1166_v39 }
 0x11e   : > { %1269 = vmatprep.subr.bf16.mxu1 %v1295_v19 }
 0x11f   : > { %v682_v48 = vmax.f32 %v666_v43, 0.0  ;;  %v644_v49 = vmul.f32 %v628_v44, %v573_v45 }
 0x120   : > { %v577_v50 = vpop.f32.mrb[30].mxu0 }
 0x121   : > { %v730_v51 = vadd.f32 %v1133_v40, %v682_v48  ;;  %v667_v52 = vadd.f32 %v1414_v26, %v644_v49  ;;  %v629_v54 = vsub.f32 %v1105_v46, %v577_v50  ;;  %v579_v55 = vpop.f32.mrb[31].mxu0 }
 0x123   : > { %v683_v56 = vmax.f32 %v667_v52, 0.0  ;;  %v645_v57 = vmul.f32 %v629_v54, %v579_v55  ;;  %v1171_v58 = vpack.c.bf16 %v730_v51, %v729_v42 }
 0x125   : > { %v731_v59 = vadd.f32 %v1136_v53, %v683_v56  ;;  %v668_v60 = vadd.f32 %v1414_v26, %v645_v57  ;;  %1197 = vst [vmem:[%s1427_s23 + $0x30] sm:$0xff] %v1171_v58   ;;  %1271 = vmatpush3.bf16.msra.mxu1 %v1171_v58 }
 0x126   : > { %1272 = vmatprep.subr.bf16.mxu1 %v1295_v19 }
 0x127   : > { %v684_v62 = vmax.f32 %v668_v60, 0.0 }
 0x129   : > { %v732_v63 = vadd.f32 %v1137_v61, %v684_v62 }
 0x12b   : > { %v1176_v0 = vpack.c.bf16 %v732_v63, %v731_v59 }
 0x12d   : > { %1198 = vst [vmem:[%s1427_s23 + $0x38] sm:$0xff] %v1176_v0   ;;  %1274 = vmatpush3.bf16.msra.mxu1 %v1176_v0 }
 0x130   : > { %1249 = vmatmul.mubr.f32.vlgmr.msra.gmra.mrb[0].mxu1 %v813_v1 }
 0x203   : > { %v880_v26 = vpop.f32.mrb[0].mxu1 }
 0x204   : > { %884 = vst [vmem:[%s353_s9] sm:$0xff] %v880_v26  ;;  %v1250_v2 = vpop.f32.mrb[1].mxu1 }
 0x205 PF: > { %s18_s24 = sadd.s32 1, %s1292_s24  }
 0x206   : > { %p15_p5 = scmp.ge.s32.totalorder %s18_s24, 4  }
 0x208   :  { %17 = sbr.rel (!%p15_p5) target bundleno = 1 (0x1), region = 95 }

</bundles_post_ra>
